<compile_context>
chip_gen: v7x
topology: tpu7x:2x2x1
jax: 0.10.0
libtpu: 0.0.40
codegen_flags: <defaults>
</compile_context>

<pallas_src>
from functools import partial

import jax
import jax.numpy as jnp
from jax.experimental import pallas as pl
from jax.experimental.pallas import tpu as pltpu


def _attention_kernel(x_ref, gamma_ref, beta_ref, wq_ref, wkv_ref, wout_ref,
                      qscale_ref, kscale_ref, nullk_ref, nullv_ref,
                      o_ref,
                      q_scr, k_scr, v_scr, out_scr,
                      *, heads, dim_head, scale):
    qi = pl.program_id(1)
    n = k_scr.shape[1]
    tq = o_ref.shape[0]
    inner = heads * dim_head
    f32 = jnp.float32
    bf16 = jnp.bfloat16

    def l2n(t):
        # matches F.normalize(t, dim=-1): t / max(||t||_2, 1e-12)
        ss = jnp.sum(t * t, axis=-1, keepdims=True)
        return t * jax.lax.rsqrt(jnp.maximum(ss, 1e-24))

    # ---- once per batch element: LayerNorm + projections -> VMEM scratch ----
    @pl.when(qi == 0)
    def _init():
        x = x_ref[...]                                          # (n, dim) f32
        mean = jnp.mean(x, axis=-1, keepdims=True)
        var = jnp.mean(jnp.square(x - mean), axis=-1, keepdims=True)
        xn = (x - mean) * jax.lax.rsqrt(var + 1e-5)
        xn = xn * gamma_ref[...] + beta_ref[...]
        xn_b = xn.astype(bf16)

        # bf16 operands, f32 accumulation on the MXU.
        q = jnp.dot(xn_b, wq_ref[...], preferred_element_type=f32)    # (n, inner)
        kv = jnp.dot(xn_b, wkv_ref[...], preferred_element_type=f32)  # (n, 2*inner)

        q_sc = qscale_ref[...]                                  # (1, d)
        k_sc = kscale_ref[...]                                  # (1, d)

        for h in range(heads):          # static unroll; runs once per batch elem
            sl = slice(h * dim_head, (h + 1) * dim_head)
            qh = q[:, sl]
            kh = kv[:, sl]
            vh = kv[:, inner + h * dim_head: inner + (h + 1) * dim_head]
            # fold the cosine-sim `scale` into q so sim = q_scr . k_scr directly
            q_scr[h] = (l2n(qh) * (q_sc * scale)).astype(bf16)
            k_scr[h] = (l2n(kh) * k_sc).astype(bf16)
            v_scr[h] = vh.astype(bf16)

    # ---- normalised + scaled null key / value (analytic null token) ----
    k_sc = kscale_ref[...]                                      # (1, d)
    nk = nullk_ref[...]                                         # (h, 1, d) f32
    nv = nullv_ref[...]                                         # (h, 1, d) f32
    nk_n = l2n(nk) * k_sc                                       # (h, 1, d)

    q0 = qi * tq
    if tq % 8 == 0:
        q0 = pl.multiple_of(q0, 8)

    # ---- per query tile: attention against the full K/V scratch ----
    for h in range(heads):                                      # static unroll
        qh = q_scr[h, pl.ds(q0, tq), :]                         # (tq, d) bf16
        kh = k_scr[h]                                           # (n, d)  bf16
        vh = v_scr[h]                                           # (n, d)  bf16

        # contraction over the last dim of both operands -> no kh.T transpose
        s = jax.lax.dot_general(qh, kh, (((1,), (1,)), ((), ())),
                                preferred_element_type=f32)     # (tq, n)
        # null-key logit column (keeps `s` at (tq, n), no ragged n+1 tensor)
        s_null = jnp.sum(qh.astype(f32) * nk_n[h], axis=-1,
                         keepdims=True)                         # (tq, 1)

        m = jnp.maximum(jnp.max(s, axis=-1, keepdims=True), s_null)
        p = jnp.exp(s - m)                                      # (tq, n) f32
        p_null = jnp.exp(s_null - m)                            # (tq, 1) f32
        denom = jnp.sum(p, axis=-1, keepdims=True) + p_null

        numer = jnp.dot(p.astype(bf16), vh,
                        preferred_element_type=f32)             # (tq, d)
        numer = numer + p_null * nv[h]
        out_h = numer * pl.reciprocal(denom, approx=True)
        out_scr[:, h * dim_head:(h + 1) * dim_head] = out_h.astype(bf16)

    o_ref[...] = jnp.dot(out_scr[...], wout_ref[...],
                         preferred_element_type=f32).astype(o_ref.dtype)


def _pick_tq(n, max_tq=512):
    """Largest divisor of n that is <= max_tq (query tile length)."""
    if n <= max_tq:
        return n
    for t in range(max_tq, 0, -1):
        if n % t == 0:
            return t
    return n


def attention_forward(x, params, *, heads, dim_head, scale=8, max_tq=512):
    b, n, dim = x.shape
    inner = heads * dim_head
    tq = _pick_tq(n, max_tq)
    nq = n // tq

    f32 = jnp.float32
    bf16 = jnp.bfloat16

    gamma = params["gamma"].reshape(1, dim).astype(f32)
    beta = params["beta"].reshape(1, dim).astype(f32)
    qscale = params["q_scale"].reshape(1, dim_head).astype(f32)
    kscale = params["k_scale"].reshape(1, dim_head).astype(f32)
    nullk = params["null_kv"][0].astype(f32)     # (heads, 1, dim_head)
    nullv = params["null_kv"][1].astype(f32)     # (heads, 1, dim_head)
    # bf16 MXU operands (accumulation stays f32 inside the kernel)
    wq = params["wq"].astype(bf16)               # (dim, inner)
    wkv = params["wkv"].astype(bf16)             # (dim, 2*inner)
    wout = params["wout"].astype(bf16)           # (inner, dim)

    kernel = partial(_attention_kernel, heads=heads, dim_head=dim_head,
                     scale=float(scale))

    def const_spec(shape):
        nd = len(shape)
        return pl.BlockSpec(shape, lambda bi, qi: (0,) * nd)

    flops = b * (6 * n * dim * inner            # q/kv projections
                 + 4 * n * (n + 1) * inner      # qk^T and attn @ v
                 + 2 * n * inner * dim)         # output projection
    bytes_accessed = 4 * 2 * b * n * dim + 2 * (3 * dim * inner + inner * dim)

    return pl.pallas_call(
        kernel,
        out_shape=jax.ShapeDtypeStruct((b, n, dim), x.dtype),
        grid=(b, nq),
        in_specs=[
            # x: full sequence for this batch element; block index ignores qi,
            # so it is only re-DMA'd when the batch index changes.
            pl.BlockSpec((pl.Squeezed(), n, dim), lambda bi, qi: (bi, 0, 0)),
            const_spec((1, dim)),                # gamma
            const_spec((1, dim)),                # beta
            const_spec((dim, inner)),            # Wq
            const_spec((dim, 2 * inner)),        # Wkv
            const_spec((inner, dim)),            # Wout
            const_spec((1, dim_head)),           # q_scale
            const_spec((1, dim_head)),           # k_scale
            const_spec((heads, 1, dim_head)),    # null k
            const_spec((heads, 1, dim_head)),    # null v
        ],
        out_specs=pl.BlockSpec((pl.Squeezed(), tq, dim),
                               lambda bi, qi: (bi, qi, 0)),
        scratch_shapes=[
            pltpu.VMEM((heads, n, dim_head), bf16),   # q (l2norm * q_scale * scale)
            pltpu.VMEM((heads, n, dim_head), bf16),   # k (l2norm * k_scale)
            pltpu.VMEM((heads, n, dim_head), bf16),   # v
            pltpu.VMEM((tq, inner), bf16),            # per-tile head outputs
        ],
        compiler_params=pltpu.CompilerParams(
            dimension_semantics=("parallel", "arbitrary"),
            vmem_limit_bytes=64 * 1024 * 1024),
        cost_estimate=pl.CostEstimate(
            flops=flops,
            transcendentals=b * heads * n * (n + 1),
            bytes_accessed=bytes_accessed),
    )(x, gamma, beta, wq, wkv, wout, qscale, kscale, nullk, nullv)


def reference_forward(x, params, *, heads, dim_head, scale=8):
    """Pure-JAX f32 reference mirroring the PyTorch forward."""
    b, n, dim = x.shape
    inner = heads * dim_head
    mean = jnp.mean(x, axis=-1, keepdims=True)
    var = jnp.mean(jnp.square(x - mean), axis=-1, keepdims=True)
    xn = (x - mean) * jax.lax.rsqrt(var + 1e-5) * params["gamma"] + params["beta"]

    q = xn @ params["wq"] * scale
    kv = xn @ params["wkv"]
    k, v = kv[..., :inner], kv[..., inner:]

    def split_heads(t):
        return t.reshape(b, n, heads, dim_head).transpose(0, 2, 1, 3)

    q, k, v = map(split_heads, (q, k, v))
    nk = jnp.broadcast_to(params["null_kv"][0], (b, heads, 1, dim_head))
    nv = jnp.broadcast_to(params["null_kv"][1], (b, heads, 1, dim_head))
    k = jnp.concatenate([nk, k], axis=-2)
    v = jnp.concatenate([nv, v], axis=-2)

    def l2norm(t):
        return t / jnp.maximum(jnp.linalg.norm(t, axis=-1, keepdims=True), 1e-12)

    q = l2norm(q) * params["q_scale"]
    k = l2norm(k) * params["k_scale"]
    sim = jnp.einsum("bhid,bhjd->bhij", q, k) * scale
    attn = jax.nn.softmax(sim, axis=-1)
    out = jnp.einsum("bhij,bhjd->bhid", attn, v)
    out = out.transpose(0, 2, 1, 3).reshape(b, n, inner)
    return out @ params["wout"]


if __name__ == "__main__":
    b, n, dim = 2, 8, 32
    heads, dim_head, scale = 2, 16, 8
    inner = heads * dim_head

    key = jax.random.PRNGKey(0)
    ks = jax.random.split(key, 6)
    x = jax.random.normal(ks[0], (b, n, dim), jnp.float32)

    params = dict(
        gamma=jnp.ones((dim,), jnp.float32),
        beta=jnp.zeros((dim,), jnp.float32),
        wq=0.02 * jax.random.normal(ks[1], (dim, inner), jnp.float32),
        wkv=0.02 * jax.random.normal(ks[2], (dim, 2 * inner), jnp.float32),
        wout=0.02 * jax.random.normal(ks[3], (inner, dim), jnp.float32),
        q_scale=jnp.ones((dim_head,), jnp.float32),
        k_scale=jnp.ones((dim_head,), jnp.float32),
        null_kv=jax.random.normal(ks[4], (2, heads, 1, dim_head), jnp.float32),
    )

    out = attention_forward(x, params, heads=heads, dim_head=dim_head, scale=scale)
    out = jax.block_until_ready(out)

    ref = reference_forward(x, params, heads=heads, dim_head=dim_head, scale=scale)
    assert out.shape == (b, n, dim)
    # bf16 MXU operands + approx reciprocal -> bf16-level tolerance vs f32 ref
    assert jnp.allclose(out, ref, atol=5e-3, rtol=5e-2), "mismatch vs reference"
    print("KERNEL_OK")
</pallas_src>

<mosaic_0001>
module attributes {stable_mosaic.version = 11 : i64} {
  func.func @_attention_kernel(%arg0: i32, %arg1: i32, %arg2: memref<1x8x32xf32, #tpu.memory_space<vmem>>, %arg3: memref<1x32xf32, #tpu.memory_space<vmem>>, %arg4: memref<1x32xf32, #tpu.memory_space<vmem>>, %arg5: memref<32x32xbf16, #tpu.memory_space<vmem>>, %arg6: memref<32x64xbf16, #tpu.memory_space<vmem>>, %arg7: memref<32x32xbf16, #tpu.memory_space<vmem>>, %arg8: memref<1x16xf32, #tpu.memory_space<vmem>>, %arg9: memref<1x16xf32, #tpu.memory_space<vmem>>, %arg10: memref<2x1x16xf32, #tpu.memory_space<vmem>>, %arg11: memref<2x1x16xf32, #tpu.memory_space<vmem>>, %arg12: memref<1x8x32xf32, #tpu.memory_space<vmem>>, %arg13: memref<2x8x16xbf16, #tpu.memory_space<vmem>>, %arg14: memref<2x8x16xbf16, #tpu.memory_space<vmem>>, %arg15: memref<2x8x16xbf16, #tpu.memory_space<vmem>>, %arg16: memref<8x32xbf16, #tpu.memory_space<vmem>>) attributes {dimension_semantics = [#tpu.dimension_semantics<parallel>, #tpu.dimension_semantics<arbitrary>], iteration_bounds = array<i64: 2, 1>, scalar_prefetch = 0 : i64, scratch_operands = 4 : i64, tpu.core_type = #tpu.core_type<tc>, window_params = [{transform_indices = @transform_0, window_bounds = array<i64: 1, 8, 32>}, {pipeline_mode = #tpu.pipeline_mode<synchronous>, transform_indices = @transform_1, window_bounds = array<i64: 1, 32>}, {pipeline_mode = #tpu.pipeline_mode<synchronous>, transform_indices = @transform_2, window_bounds = array<i64: 1, 32>}, {pipeline_mode = #tpu.pipeline_mode<synchronous>, transform_indices = @transform_3, window_bounds = array<i64: 32, 32>}, {pipeline_mode = #tpu.pipeline_mode<synchronous>, transform_indices = @transform_4, window_bounds = array<i64: 32, 64>}, {pipeline_mode = #tpu.pipeline_mode<synchronous>, transform_indices = @transform_5, window_bounds = array<i64: 32, 32>}, {pipeline_mode = #tpu.pipeline_mode<synchronous>, transform_indices = @transform_6, window_bounds = array<i64: 1, 16>}, {pipeline_mode = #tpu.pipeline_mode<synchronous>, transform_indices = @transform_7, window_bounds = array<i64: 1, 16>}, {pipeline_mode = #tpu.pipeline_mode<synchronous>, transform_indices = @transform_8, window_bounds = array<i64: 2, 1, 16>}, {pipeline_mode = #tpu.pipeline_mode<synchronous>, transform_indices = @transform_9, window_bounds = array<i64: 2, 1, 16>}, {transform_indices = @transform_10, window_bounds = array<i64: 1, 8, 32>}]} {
    %c0_i32 = arith.constant 0 : i32
    %0 = arith.cmpi eq, %arg1, %c0_i32 : i32
    %1 = arith.extui %0 : i1 to i32
    %c0_i32_0 = arith.constant 0 : i32
    %2 = arith.cmpi ne, %1, %c0_i32_0 : i32
    scf.if %2 {
      %c0_45 = arith.constant 0 : index
      %c0_46 = arith.constant 0 : index
      %c0_47 = arith.constant 0 : index
      %103 = vector.load %arg2[%c0_45, %c0_46, %c0_47] : memref<1x8x32xf32, #tpu.memory_space<vmem>>, vector<1x8x32xf32>
      %104 = vector.shape_cast %103 : vector<1x8x32xf32> to vector<8x32xf32>
      %cst_48 = arith.constant dense<0.000000e+00> : vector<8xf32>
      %105 = vector.multi_reduction <add>, %104, %cst_48 [1] : vector<8x32xf32> to vector<8xf32>
      %106 = vector.shape_cast %105 : vector<8xf32> to vector<8x1xf32>
      %cst_49 = arith.constant 3.200000e+01 : f32
      %107 = vector.broadcast %cst_49 : f32 to vector<8x1xf32>
      %108 = arith.divf %106, %107 : vector<8x1xf32>
      %109 = vector.broadcast %108 : vector<8x1xf32> to vector<8x32xf32>
      %110 = arith.subf %104, %109 : vector<8x32xf32>
      %111 = arith.mulf %110, %110 : vector<8x32xf32>
      %cst_50 = arith.constant dense<0.000000e+00> : vector<8xf32>
      %112 = vector.multi_reduction <add>, %111, %cst_50 [1] : vector<8x32xf32> to vector<8xf32>
      %113 = vector.shape_cast %112 : vector<8xf32> to vector<8x1xf32>
      %cst_51 = arith.constant 3.200000e+01 : f32
      %114 = vector.broadcast %cst_51 : f32 to vector<8x1xf32>
      %115 = arith.divf %113, %114 : vector<8x1xf32>
      %116 = vector.broadcast %108 : vector<8x1xf32> to vector<8x32xf32>
      %117 = arith.subf %104, %116 : vector<8x32xf32>
      %cst_52 = arith.constant 9.99999974E-6 : f32
      %118 = vector.broadcast %cst_52 : f32 to vector<8x1xf32>
      %119 = arith.addf %115, %118 : vector<8x1xf32>
      %120 = math.rsqrt %119 : vector<8x1xf32>
      %121 = vector.broadcast %120 : vector<8x1xf32> to vector<8x32xf32>
      %122 = arith.mulf %117, %121 : vector<8x32xf32>
      %c0_53 = arith.constant 0 : index
      %c0_54 = arith.constant 0 : index
      %123 = vector.load %arg3[%c0_53, %c0_54] : memref<1x32xf32, #tpu.memory_space<vmem>>, vector<1x32xf32>
      %124 = vector.broadcast %123 : vector<1x32xf32> to vector<8x32xf32>
      %125 = arith.mulf %122, %124 : vector<8x32xf32>
      %c0_55 = arith.constant 0 : index
      %c0_56 = arith.constant 0 : index
      %126 = vector.load %arg4[%c0_55, %c0_56] : memref<1x32xf32, #tpu.memory_space<vmem>>, vector<1x32xf32>
      %127 = vector.broadcast %126 : vector<1x32xf32> to vector<8x32xf32>
      %128 = arith.addf %125, %127 : vector<8x32xf32>
      %129 = arith.truncf %128 : vector<8x32xf32> to vector<8x32xbf16>
      %c0_57 = arith.constant 0 : index
      %c0_58 = arith.constant 0 : index
      %130 = vector.load %arg5[%c0_57, %c0_58] : memref<32x32xbf16, #tpu.memory_space<vmem>>, vector<32x32xbf16>
      %cst_59 = arith.constant dense<0.000000e+00> : vector<8x32xf32>
      %131 = tpu.matmul %129, %130, %cst_59 {dimension_numbers = #tpu.dot_dimension_numbers<[1], [0], [0], [1], [0, 0, 1, 1], [], []>} : vector<8x32xbf16>, vector<32x32xbf16>, vector<8x32xf32> -> vector<8x32xf32>
      %c0_60 = arith.constant 0 : index
      %c0_61 = arith.constant 0 : index
      %132 = vector.load %arg6[%c0_60, %c0_61] : memref<32x64xbf16, #tpu.memory_space<vmem>>, vector<32x64xbf16>
      %cst_62 = arith.constant dense<0.000000e+00> : vector<8x64xf32>
      %133 = tpu.matmul %129, %132, %cst_62 {dimension_numbers = #tpu.dot_dimension_numbers<[1], [0], [0], [1], [0, 0, 1, 1], [], []>} : vector<8x32xbf16>, vector<32x64xbf16>, vector<8x64xf32> -> vector<8x64xf32>
      %c0_63 = arith.constant 0 : index
      %c0_64 = arith.constant 0 : index
      %134 = vector.load %arg8[%c0_63, %c0_64] : memref<1x16xf32, #tpu.memory_space<vmem>>, vector<1x16xf32>
      %c0_65 = arith.constant 0 : index
      %c0_66 = arith.constant 0 : index
      %135 = vector.load %arg9[%c0_65, %c0_66] : memref<1x16xf32, #tpu.memory_space<vmem>>, vector<1x16xf32>
      %136 = vector.extract_strided_slice %131 {offsets = [0, 0], sizes = [8, 16], strides = [1, 1]} : vector<8x32xf32> to vector<8x16xf32>
      %137 = vector.extract_strided_slice %133 {offsets = [0, 0], sizes = [8, 16], strides = [1, 1]} : vector<8x64xf32> to vector<8x16xf32>
      %138 = vector.extract_strided_slice %133 {offsets = [0, 32], sizes = [8, 16], strides = [1, 1]} : vector<8x64xf32> to vector<8x16xf32>
      %139 = arith.mulf %136, %136 : vector<8x16xf32>
      %cst_67 = arith.constant dense<0.000000e+00> : vector<8xf32>
      %140 = vector.multi_reduction <add>, %139, %cst_67 [1] : vector<8x16xf32> to vector<8xf32>
      %141 = vector.shape_cast %140 : vector<8xf32> to vector<8x1xf32>
      %cst_68 = arith.constant 1.000000e-24 : f32
      %142 = vector.broadcast %cst_68 : f32 to vector<8x1xf32>
      %143 = arith.maximumf %141, %142 : vector<8x1xf32>
      %144 = math.rsqrt %143 : vector<8x1xf32>
      %145 = vector.broadcast %144 : vector<8x1xf32> to vector<8x16xf32>
      %146 = arith.mulf %136, %145 : vector<8x16xf32>
      %cst_69 = arith.constant 8.000000e+00 : f32
      %147 = vector.broadcast %cst_69 : f32 to vector<1x16xf32>
      %148 = arith.mulf %134, %147 : vector<1x16xf32>
      %149 = vector.broadcast %148 : vector<1x16xf32> to vector<8x16xf32>
      %150 = arith.mulf %146, %149 : vector<8x16xf32>
      %151 = arith.truncf %150 : vector<8x16xf32> to vector<8x16xbf16>
      %c0_70 = arith.constant 0 : index
      %c0_71 = arith.constant 0 : index
      %c0_72 = arith.constant 0 : index
      %152 = vector.load %arg13[%c0_70, %c0_71, %c0_72] : memref<2x8x16xbf16, #tpu.memory_space<vmem>>, vector<1x8x16xbf16>
      %153 = vector.shape_cast %152 : vector<1x8x16xbf16> to vector<8x16xbf16>
      %154 = vector.shape_cast %151 : vector<8x16xbf16> to vector<1x8x16xbf16>
      tpu.vector_store %arg13[%c0_70, %c0_71, %c0_72], %154 {strides = array<i32>} : memref<2x8x16xbf16, #tpu.memory_space<vmem>>, vector<1x8x16xbf16>,
      %155 = arith.mulf %137, %137 : vector<8x16xf32>
      %cst_73 = arith.constant dense<0.000000e+00> : vector<8xf32>
      %156 = vector.multi_reduction <add>, %155, %cst_73 [1] : vector<8x16xf32> to vector<8xf32>
      %157 = vector.shape_cast %156 : vector<8xf32> to vector<8x1xf32>
      %cst_74 = arith.constant 1.000000e-24 : f32
      %158 = vector.broadcast %cst_74 : f32 to vector<8x1xf32>
      %159 = arith.maximumf %157, %158 : vector<8x1xf32>
      %160 = math.rsqrt %159 : vector<8x1xf32>
      %161 = vector.broadcast %160 : vector<8x1xf32> to vector<8x16xf32>
      %162 = arith.mulf %137, %161 : vector<8x16xf32>
      %163 = vector.broadcast %135 : vector<1x16xf32> to vector<8x16xf32>
      %164 = arith.mulf %162, %163 : vector<8x16xf32>
      %165 = arith.truncf %164 : vector<8x16xf32> to vector<8x16xbf16>
      %c0_75 = arith.constant 0 : index
      %c0_76 = arith.constant 0 : index
      %c0_77 = arith.constant 0 : index
      %166 = vector.load %arg14[%c0_75, %c0_76, %c0_77] : memref<2x8x16xbf16, #tpu.memory_space<vmem>>, vector<1x8x16xbf16>
      %167 = vector.shape_cast %166 : vector<1x8x16xbf16> to vector<8x16xbf16>
      %168 = vector.shape_cast %165 : vector<8x16xbf16> to vector<1x8x16xbf16>
      tpu.vector_store %arg14[%c0_75, %c0_76, %c0_77], %168 {strides = array<i32>} : memref<2x8x16xbf16, #tpu.memory_space<vmem>>, vector<1x8x16xbf16>,
      %169 = arith.truncf %138 : vector<8x16xf32> to vector<8x16xbf16>
      %c0_78 = arith.constant 0 : index
      %c0_79 = arith.constant 0 : index
      %c0_80 = arith.constant 0 : index
      %170 = vector.load %arg15[%c0_78, %c0_79, %c0_80] : memref<2x8x16xbf16, #tpu.memory_space<vmem>>, vector<1x8x16xbf16>
      %171 = vector.shape_cast %170 : vector<1x8x16xbf16> to vector<8x16xbf16>
      %172 = vector.shape_cast %169 : vector<8x16xbf16> to vector<1x8x16xbf16>
      tpu.vector_store %arg15[%c0_78, %c0_79, %c0_80], %172 {strides = array<i32>} : memref<2x8x16xbf16, #tpu.memory_space<vmem>>, vector<1x8x16xbf16>,
      %173 = vector.extract_strided_slice %131 {offsets = [0, 16], sizes = [8, 16], strides = [1, 1]} : vector<8x32xf32> to vector<8x16xf32>
      %174 = vector.extract_strided_slice %133 {offsets = [0, 16], sizes = [8, 16], strides = [1, 1]} : vector<8x64xf32> to vector<8x16xf32>
      %175 = vector.extract_strided_slice %133 {offsets = [0, 48], sizes = [8, 16], strides = [1, 1]} : vector<8x64xf32> to vector<8x16xf32>
      %176 = arith.mulf %173, %173 : vector<8x16xf32>
      %cst_81 = arith.constant dense<0.000000e+00> : vector<8xf32>
      %177 = vector.multi_reduction <add>, %176, %cst_81 [1] : vector<8x16xf32> to vector<8xf32>
      %178 = vector.shape_cast %177 : vector<8xf32> to vector<8x1xf32>
      %cst_82 = arith.constant 1.000000e-24 : f32
      %179 = vector.broadcast %cst_82 : f32 to vector<8x1xf32>
      %180 = arith.maximumf %178, %179 : vector<8x1xf32>
      %181 = math.rsqrt %180 : vector<8x1xf32>
      %182 = vector.broadcast %181 : vector<8x1xf32> to vector<8x16xf32>
      %183 = arith.mulf %173, %182 : vector<8x16xf32>
      %cst_83 = arith.constant 8.000000e+00 : f32
      %184 = vector.broadcast %cst_83 : f32 to vector<1x16xf32>
      %185 = arith.mulf %134, %184 : vector<1x16xf32>
      %186 = vector.broadcast %185 : vector<1x16xf32> to vector<8x16xf32>
      %187 = arith.mulf %183, %186 : vector<8x16xf32>
      %188 = arith.truncf %187 : vector<8x16xf32> to vector<8x16xbf16>
      %c1_84 = arith.constant 1 : index
      %c0_85 = arith.constant 0 : index
      %c0_86 = arith.constant 0 : index
      %189 = vector.load %arg13[%c1_84, %c0_85, %c0_86] : memref<2x8x16xbf16, #tpu.memory_space<vmem>>, vector<1x8x16xbf16>
      %190 = vector.shape_cast %189 : vector<1x8x16xbf16> to vector<8x16xbf16>
      %191 = vector.shape_cast %188 : vector<8x16xbf16> to vector<1x8x16xbf16>
      tpu.vector_store %arg13[%c1_84, %c0_85, %c0_86], %191 {strides = array<i32>} : memref<2x8x16xbf16, #tpu.memory_space<vmem>>, vector<1x8x16xbf16>,
      %192 = arith.mulf %174, %174 : vector<8x16xf32>
      %cst_87 = arith.constant dense<0.000000e+00> : vector<8xf32>
      %193 = vector.multi_reduction <add>, %192, %cst_87 [1] : vector<8x16xf32> to vector<8xf32>
      %194 = vector.shape_cast %193 : vector<8xf32> to vector<8x1xf32>
      %cst_88 = arith.constant 1.000000e-24 : f32
      %195 = vector.broadcast %cst_88 : f32 to vector<8x1xf32>
      %196 = arith.maximumf %194, %195 : vector<8x1xf32>
      %197 = math.rsqrt %196 : vector<8x1xf32>
      %198 = vector.broadcast %197 : vector<8x1xf32> to vector<8x16xf32>
      %199 = arith.mulf %174, %198 : vector<8x16xf32>
      %200 = vector.broadcast %135 : vector<1x16xf32> to vector<8x16xf32>
      %201 = arith.mulf %199, %200 : vector<8x16xf32>
      %202 = arith.truncf %201 : vector<8x16xf32> to vector<8x16xbf16>
      %c1_89 = arith.constant 1 : index
      %c0_90 = arith.constant 0 : index
      %c0_91 = arith.constant 0 : index
      %203 = vector.load %arg14[%c1_89, %c0_90, %c0_91] : memref<2x8x16xbf16, #tpu.memory_space<vmem>>, vector<1x8x16xbf16>
      %204 = vector.shape_cast %203 : vector<1x8x16xbf16> to vector<8x16xbf16>
      %205 = vector.shape_cast %202 : vector<8x16xbf16> to vector<1x8x16xbf16>
      tpu.vector_store %arg14[%c1_89, %c0_90, %c0_91], %205 {strides = array<i32>} : memref<2x8x16xbf16, #tpu.memory_space<vmem>>, vector<1x8x16xbf16>,
      %206 = arith.truncf %175 : vector<8x16xf32> to vector<8x16xbf16>
      %c1_92 = arith.constant 1 : index
      %c0_93 = arith.constant 0 : index
      %c0_94 = arith.constant 0 : index
      %207 = vector.load %arg15[%c1_92, %c0_93, %c0_94] : memref<2x8x16xbf16, #tpu.memory_space<vmem>>, vector<1x8x16xbf16>
      %208 = vector.shape_cast %207 : vector<1x8x16xbf16> to vector<8x16xbf16>
      %209 = vector.shape_cast %206 : vector<8x16xbf16> to vector<1x8x16xbf16>
      tpu.vector_store %arg15[%c1_92, %c0_93, %c0_94], %209 {strides = array<i32>} : memref<2x8x16xbf16, #tpu.memory_space<vmem>>, vector<1x8x16xbf16>,
    } else {
    }
    %c0 = arith.constant 0 : index
    %c0_1 = arith.constant 0 : index
    %3 = vector.load %arg9[%c0, %c0_1] : memref<1x16xf32, #tpu.memory_space<vmem>>, vector<1x16xf32>
    %c0_2 = arith.constant 0 : index
    %c0_3 = arith.constant 0 : index
    %c0_4 = arith.constant 0 : index
    %4 = vector.load %arg10[%c0_2, %c0_3, %c0_4] : memref<2x1x16xf32, #tpu.memory_space<vmem>>, vector<2x1x16xf32>
    %c0_5 = arith.constant 0 : index
    %c0_6 = arith.constant 0 : index
    %c0_7 = arith.constant 0 : index
    %5 = vector.load %arg11[%c0_5, %c0_6, %c0_7] : memref<2x1x16xf32, #tpu.memory_space<vmem>>, vector<2x1x16xf32>
    %6 = arith.mulf %4, %4 : vector<2x1x16xf32>
    %cst = arith.constant dense<0.000000e+00> : vector<2x1xf32>
    %7 = vector.multi_reduction <add>, %6, %cst [2] : vector<2x1x16xf32> to vector<2x1xf32>
    %8 = vector.shape_cast %7 : vector<2x1xf32> to vector<2x1x1xf32>
    %cst_8 = arith.constant 1.000000e-24 : f32
    %9 = vector.broadcast %cst_8 : f32 to vector<2x1x1xf32>
    %10 = arith.maximumf %8, %9 : vector<2x1x1xf32>
    %11 = math.rsqrt %10 : vector<2x1x1xf32>
    %12 = vector.broadcast %11 : vector<2x1x1xf32> to vector<2x1x16xf32>
    %13 = arith.mulf %4, %12 : vector<2x1x16xf32>
    %14 = vector.shape_cast %3 : vector<1x16xf32> to vector<1x1x16xf32>
    %15 = vector.broadcast %14 : vector<1x1x16xf32> to vector<2x1x16xf32>
    %16 = arith.mulf %13, %15 : vector<2x1x16xf32>
    %c8_i32 = arith.constant 8 : i32
    %17 = arith.muli %arg1, %c8_i32 : i32
    %18 = tpu.assume_multiple %17, 8 : i32
    %c0_9 = arith.constant 0 : index
    %19 = arith.index_cast %18 : i32 to index
    %c0_10 = arith.constant 0 : index
    %20 = vector.load %arg13[%c0_9, %19, %c0_10] : memref<2x8x16xbf16, #tpu.memory_space<vmem>>, vector<1x8x16xbf16>
    %21 = vector.shape_cast %20 : vector<1x8x16xbf16> to vector<8x16xbf16>
    %c0_11 = arith.constant 0 : index
    %c0_12 = arith.constant 0 : index
    %c0_13 = arith.constant 0 : index
    %22 = vector.load %arg14[%c0_11, %c0_12, %c0_13] : memref<2x8x16xbf16, #tpu.memory_space<vmem>>, vector<1x8x16xbf16>
    %23 = vector.shape_cast %22 : vector<1x8x16xbf16> to vector<8x16xbf16>
    %c0_14 = arith.constant 0 : index
    %c0_15 = arith.constant 0 : index
    %c0_16 = arith.constant 0 : index
    %24 = vector.load %arg15[%c0_14, %c0_15, %c0_16] : memref<2x8x16xbf16, #tpu.memory_space<vmem>>, vector<1x8x16xbf16>
    %25 = vector.shape_cast %24 : vector<1x8x16xbf16> to vector<8x16xbf16>
    %cst_17 = arith.constant dense<0.000000e+00> : vector<8x8xf32>
    %26 = tpu.matmul %21, %23, %cst_17 {dimension_numbers = #tpu.dot_dimension_numbers<[1], [1], [0], [0], [0, 0, 1, 0], [], []>} : vector<8x16xbf16>, vector<8x16xbf16>, vector<8x8xf32> -> vector<8x8xf32>
    %27 = arith.extf %21 : vector<8x16xbf16> to vector<8x16xf32>
    %28 = vector.extract_strided_slice %16 {offsets = [0, 0, 0], sizes = [1, 1, 16], strides = [1, 1, 1]} : vector<2x1x16xf32> to vector<1x1x16xf32>
    %29 = vector.shape_cast %28 : vector<1x1x16xf32> to vector<1x16xf32>
    %30 = vector.broadcast %29 : vector<1x16xf32> to vector<8x16xf32>
    %31 = arith.mulf %27, %30 : vector<8x16xf32>
    %cst_18 = arith.constant dense<0.000000e+00> : vector<8xf32>
    %32 = vector.multi_reduction <add>, %31, %cst_18 [1] : vector<8x16xf32> to vector<8xf32>
    %33 = vector.shape_cast %32 : vector<8xf32> to vector<8x1xf32>
    %cst_19 = arith.constant dense<0xFF800000> : vector<8xf32>
    %34 = vector.multi_reduction <maximumf>, %26, %cst_19 [1] : vector<8x8xf32> to vector<8xf32>
    %35 = vector.shape_cast %34 : vector<8xf32> to vector<8x1xf32>
    %36 = arith.maximumf %35, %33 : vector<8x1xf32>
    %37 = vector.broadcast %36 : vector<8x1xf32> to vector<8x8xf32>
    %38 = arith.subf %26, %37 : vector<8x8xf32>
    %39 = math.exp %38 : vector<8x8xf32>
    %40 = arith.subf %33, %36 : vector<8x1xf32>
    %41 = math.exp %40 : vector<8x1xf32>
    %cst_20 = arith.constant dense<0.000000e+00> : vector<8xf32>
    %42 = vector.multi_reduction <add>, %39, %cst_20 [1] : vector<8x8xf32> to vector<8xf32>
    %43 = vector.shape_cast %42 : vector<8xf32> to vector<8x1xf32>
    %44 = arith.addf %43, %41 : vector<8x1xf32>
    %45 = arith.truncf %39 : vector<8x8xf32> to vector<8x8xbf16>
    %cst_21 = arith.constant dense<0.000000e+00> : vector<8x16xf32>
    %46 = tpu.matmul %45, %25, %cst_21 {dimension_numbers = #tpu.dot_dimension_numbers<[1], [0], [0], [1], [0, 0, 1, 1], [], []>} : vector<8x8xbf16>, vector<8x16xbf16>, vector<8x16xf32> -> vector<8x16xf32>
    %47 = vector.extract_strided_slice %5 {offsets = [0, 0, 0], sizes = [1, 1, 16], strides = [1, 1, 1]} : vector<2x1x16xf32> to vector<1x1x16xf32>
    %48 = vector.shape_cast %47 : vector<1x1x16xf32> to vector<1x16xf32>
    %49 = vector.broadcast %41 : vector<8x1xf32> to vector<8x16xf32>
    %50 = vector.broadcast %48 : vector<1x16xf32> to vector<8x16xf32>
    %51 = arith.mulf %49, %50 : vector<8x16xf32>
    %52 = arith.addf %46, %51 : vector<8x16xf32>
    %53 = tpu.reciprocal %44 {approx = true} : vector<8x1xf32> -> vector<8x1xf32>
    %54 = vector.broadcast %53 : vector<8x1xf32> to vector<8x16xf32>
    %55 = arith.mulf %52, %54 : vector<8x16xf32>
    %56 = arith.truncf %55 : vector<8x16xf32> to vector<8x16xbf16>
    %c0_22 = arith.constant 0 : index
    %c0_23 = arith.constant 0 : index
    %57 = vector.load %arg16[%c0_22, %c0_23] : memref<8x32xbf16, #tpu.memory_space<vmem>>, vector<8x16xbf16>
    tpu.vector_store %arg16[%c0_22, %c0_23], %56 {strides = array<i32>} : memref<8x32xbf16, #tpu.memory_space<vmem>>, vector<8x16xbf16>,
    %c1 = arith.constant 1 : index
    %58 = arith.index_cast %18 : i32 to index
    %c0_24 = arith.constant 0 : index
    %59 = vector.load %arg13[%c1, %58, %c0_24] : memref<2x8x16xbf16, #tpu.memory_space<vmem>>, vector<1x8x16xbf16>
    %60 = vector.shape_cast %59 : vector<1x8x16xbf16> to vector<8x16xbf16>
    %c1_25 = arith.constant 1 : index
    %c0_26 = arith.constant 0 : index
    %c0_27 = arith.constant 0 : index
    %61 = vector.load %arg14[%c1_25, %c0_26, %c0_27] : memref<2x8x16xbf16, #tpu.memory_space<vmem>>, vector<1x8x16xbf16>
    %62 = vector.shape_cast %61 : vector<1x8x16xbf16> to vector<8x16xbf16>
    %c1_28 = arith.constant 1 : index
    %c0_29 = arith.constant 0 : index
    %c0_30 = arith.constant 0 : index
    %63 = vector.load %arg15[%c1_28, %c0_29, %c0_30] : memref<2x8x16xbf16, #tpu.memory_space<vmem>>, vector<1x8x16xbf16>
    %64 = vector.shape_cast %63 : vector<1x8x16xbf16> to vector<8x16xbf16>
    %cst_31 = arith.constant dense<0.000000e+00> : vector<8x8xf32>
    %65 = tpu.matmul %60, %62, %cst_31 {dimension_numbers = #tpu.dot_dimension_numbers<[1], [1], [0], [0], [0, 0, 1, 0], [], []>} : vector<8x16xbf16>, vector<8x16xbf16>, vector<8x8xf32> -> vector<8x8xf32>
    %66 = arith.extf %60 : vector<8x16xbf16> to vector<8x16xf32>
    %67 = vector.extract_strided_slice %16 {offsets = [1, 0, 0], sizes = [1, 1, 16], strides = [1, 1, 1]} : vector<2x1x16xf32> to vector<1x1x16xf32>
    %68 = vector.shape_cast %67 : vector<1x1x16xf32> to vector<1x16xf32>
    %69 = vector.broadcast %68 : vector<1x16xf32> to vector<8x16xf32>
    %70 = arith.mulf %66, %69 : vector<8x16xf32>
    %cst_32 = arith.constant dense<0.000000e+00> : vector<8xf32>
    %71 = vector.multi_reduction <add>, %70, %cst_32 [1] : vector<8x16xf32> to vector<8xf32>
    %72 = vector.shape_cast %71 : vector<8xf32> to vector<8x1xf32>
    %cst_33 = arith.constant dense<0xFF800000> : vector<8xf32>
    %73 = vector.multi_reduction <maximumf>, %65, %cst_33 [1] : vector<8x8xf32> to vector<8xf32>
    %74 = vector.shape_cast %73 : vector<8xf32> to vector<8x1xf32>
    %75 = arith.maximumf %74, %72 : vector<8x1xf32>
    %76 = vector.broadcast %75 : vector<8x1xf32> to vector<8x8xf32>
    %77 = arith.subf %65, %76 : vector<8x8xf32>
    %78 = math.exp %77 : vector<8x8xf32>
    %79 = arith.subf %72, %75 : vector<8x1xf32>
    %80 = math.exp %79 : vector<8x1xf32>
    %cst_34 = arith.constant dense<0.000000e+00> : vector<8xf32>
    %81 = vector.multi_reduction <add>, %78, %cst_34 [1] : vector<8x8xf32> to vector<8xf32>
    %82 = vector.shape_cast %81 : vector<8xf32> to vector<8x1xf32>
    %83 = arith.addf %82, %80 : vector<8x1xf32>
    %84 = arith.truncf %78 : vector<8x8xf32> to vector<8x8xbf16>
    %cst_35 = arith.constant dense<0.000000e+00> : vector<8x16xf32>
    %85 = tpu.matmul %84, %64, %cst_35 {dimension_numbers = #tpu.dot_dimension_numbers<[1], [0], [0], [1], [0, 0, 1, 1], [], []>} : vector<8x8xbf16>, vector<8x16xbf16>, vector<8x16xf32> -> vector<8x16xf32>
    %86 = vector.extract_strided_slice %5 {offsets = [1, 0, 0], sizes = [1, 1, 16], strides = [1, 1, 1]} : vector<2x1x16xf32> to vector<1x1x16xf32>
    %87 = vector.shape_cast %86 : vector<1x1x16xf32> to vector<1x16xf32>
    %88 = vector.broadcast %80 : vector<8x1xf32> to vector<8x16xf32>
    %89 = vector.broadcast %87 : vector<1x16xf32> to vector<8x16xf32>
    %90 = arith.mulf %88, %89 : vector<8x16xf32>
    %91 = arith.addf %85, %90 : vector<8x16xf32>
    %92 = tpu.reciprocal %83 {approx = true} : vector<8x1xf32> -> vector<8x1xf32>
    %93 = vector.broadcast %92 : vector<8x1xf32> to vector<8x16xf32>
    %94 = arith.mulf %91, %93 : vector<8x16xf32>
    %95 = arith.truncf %94 : vector<8x16xf32> to vector<8x16xbf16>
    %c0_36 = arith.constant 0 : index
    %c16 = arith.constant 16 : index
    %96 = vector.load %arg16[%c0_36, %c16] : memref<8x32xbf16, #tpu.memory_space<vmem>>, vector<8x16xbf16>
    tpu.vector_store %arg16[%c0_36, %c16], %95 {strides = array<i32>} : memref<8x32xbf16, #tpu.memory_space<vmem>>, vector<8x16xbf16>,
    %c0_37 = arith.constant 0 : index
    %c0_38 = arith.constant 0 : index
    %97 = vector.load %arg16[%c0_37, %c0_38] : memref<8x32xbf16, #tpu.memory_space<vmem>>, vector<8x32xbf16>
    %c0_39 = arith.constant 0 : index
    %c0_40 = arith.constant 0 : index
    %98 = vector.load %arg7[%c0_39, %c0_40] : memref<32x32xbf16, #tpu.memory_space<vmem>>, vector<32x32xbf16>
    %cst_41 = arith.constant dense<0.000000e+00> : vector<8x32xf32>
    %99 = tpu.matmul %97, %98, %cst_41 {dimension_numbers = #tpu.dot_dimension_numbers<[1], [0], [0], [1], [0, 0, 1, 1], [], []>} : vector<8x32xbf16>, vector<32x32xbf16>, vector<8x32xf32> -> vector<8x32xf32>
    %c0_42 = arith.constant 0 : index
    %c0_43 = arith.constant 0 : index
    %c0_44 = arith.constant 0 : index
    %100 = vector.load %arg12[%c0_42, %c0_43, %c0_44] : memref<1x8x32xf32, #tpu.memory_space<vmem>>, vector<1x8x32xf32>
    %101 = vector.shape_cast %100 : vector<1x8x32xf32> to vector<8x32xf32>
    %102 = vector.shape_cast %99 : vector<8x32xf32> to vector<1x8x32xf32>
    tpu.vector_store %arg12[%c0_42, %c0_43, %c0_44], %102 {strides = array<i32>} : memref<1x8x32xf32, #tpu.memory_space<vmem>>, vector<1x8x32xf32>,
    return
  }
  func.func @transform_0(%arg0: i32, %arg1: i32) -> (i32, i32, i32) {
    %c0_i32 = arith.constant 0 : i32
    %c0_i32_0 = arith.constant 0 : i32
    %c0_i32_1 = arith.constant 0 : i32
    return %arg0, %c0_i32, %c0_i32_0 : i32, i32, i32
  }
  func.func @transform_1(%arg0: i32, %arg1: i32) -> (i32, i32) {
    %c0_i32 = arith.constant 0 : i32
    %c0_i32_0 = arith.constant 0 : i32
    %c0_i32_1 = arith.constant 0 : i32
    return %c0_i32, %c0_i32_0 : i32, i32
  }
  func.func @transform_2(%arg0: i32, %arg1: i32) -> (i32, i32) {
    %c0_i32 = arith.constant 0 : i32
    %c0_i32_0 = arith.constant 0 : i32
    %c0_i32_1 = arith.constant 0 : i32
    return %c0_i32, %c0_i32_0 : i32, i32
  }
  func.func @transform_3(%arg0: i32, %arg1: i32) -> (i32, i32) {
    %c0_i32 = arith.constant 0 : i32
    %c0_i32_0 = arith.constant 0 : i32
    %c0_i32_1 = arith.constant 0 : i32
    return %c0_i32, %c0_i32_0 : i32, i32
  }
  func.func @transform_4(%arg0: i32, %arg1: i32) -> (i32, i32) {
    %c0_i32 = arith.constant 0 : i32
    %c0_i32_0 = arith.constant 0 : i32
    %c0_i32_1 = arith.constant 0 : i32
    return %c0_i32, %c0_i32_0 : i32, i32
  }
  func.func @transform_5(%arg0: i32, %arg1: i32) -> (i32, i32) {
    %c0_i32 = arith.constant 0 : i32
    %c0_i32_0 = arith.constant 0 : i32
    %c0_i32_1 = arith.constant 0 : i32
    return %c0_i32, %c0_i32_0 : i32, i32
  }
  func.func @transform_6(%arg0: i32, %arg1: i32) -> (i32, i32) {
    %c0_i32 = arith.constant 0 : i32
    %c0_i32_0 = arith.constant 0 : i32
    %c0_i32_1 = arith.constant 0 : i32
    return %c0_i32, %c0_i32_0 : i32, i32
  }
  func.func @transform_7(%arg0: i32, %arg1: i32) -> (i32, i32) {
    %c0_i32 = arith.constant 0 : i32
    %c0_i32_0 = arith.constant 0 : i32
    %c0_i32_1 = arith.constant 0 : i32
    return %c0_i32, %c0_i32_0 : i32, i32
  }
  func.func @transform_8(%arg0: i32, %arg1: i32) -> (i32, i32, i32) {
    %c0_i32 = arith.constant 0 : i32
    %c0_i32_0 = arith.constant 0 : i32
    %c0_i32_1 = arith.constant 0 : i32
    %c0_i32_2 = arith.constant 0 : i32
    return %c0_i32, %c0_i32_0, %c0_i32_1 : i32, i32, i32
  }
  func.func @transform_9(%arg0: i32, %arg1: i32) -> (i32, i32, i32) {
    %c0_i32 = arith.constant 0 : i32
    %c0_i32_0 = arith.constant 0 : i32
    %c0_i32_1 = arith.constant 0 : i32
    %c0_i32_2 = arith.constant 0 : i32
    return %c0_i32, %c0_i32_0, %c0_i32_1 : i32, i32, i32
  }
  func.func @transform_10(%arg0: i32, %arg1: i32) -> (i32, i32, i32) {
    %c0_i32 = arith.constant 0 : i32
    %c0_i32_0 = arith.constant 0 : i32
    return %arg0, %arg1, %c0_i32 : i32, i32, i32
  }
}

</mosaic_0001>

<bundles_post_ra>
// kernel: tpu_custom_call.1
= control target key start
LH: loop header
LB: loop body
LE: loop exit
PB: predicated region body
PF: predicated region fallthrough
CT: control target
= control target key end

     0   :  { %s2573_s0 = inlined_call_operand.hbm [shape: f32[2,8,32], index: 0, kind: input, shape index: {}]   ;;  %s2574_s1 = inlined_call_operand.hbm [shape: f32[1,32], index: 1, kind: input, shape index: {}]   ;;  %s2575_s2 = inlined_call_operand.hbm [shape: f32[1,32], index: 2, kind: input, shape index: {}]   ;;  %s2576_s3 = inlined_call_operand.hbm [shape: bf16[32,32], index: 3, kind: input, shape index: {}]   ;;  %s2577_s4 = inlined_call_operand.hbm [shape: bf16[32,64], index: 4, kind: input, shape index: {}]   ;;  %s2578_s5 = inlined_call_operand.hbm [shape: bf16[32,32], index: 5, kind: input, shape index: {}]   ;;  %s2579_s6 = inlined_call_operand.hbm [shape: f32[1,16], index: 6, kind: input, shape index: {}]   ;;  %s2580_s7 = inlined_call_operand.hbm [shape: f32[1,16], index: 7, kind: input, shape index: {}]   ;;  %s2581_s8 = inlined_call_operand.hbm [shape: f32[2,1,16], index: 8, kind: input, shape index: {}]   ;;  %s2582_s9 = inlined_call_operand.hbm [shape: f32[2,1,16], index: 9, kind: input, shape index: {}]   ;;  %s2583_s10 = inlined_call_operand.hbm [shape: f32[2,8,32], index: 10, kind: output, shape index: {}]  }
   0x1   :  { %2591 = sst [smem:[#allocation33_spill]] %s2574_s1 }
   0x2   :  { %2592 = sst [smem:[#allocation34_spill]] %s2576_s3 }
   0x3   :  { %2593 = sst [smem:[#allocation35_spill]] %s2583_s10 }
   0x4   :  { %15 = vsyncpa [#allocation7], 0 }
   0x5   :  { %17 = vsyncpa [#allocation7 + $0x1], 0 }
   0x6   :  { %18 = vsyncpa [#allocation10], 0 }
   0x7   :  { %19 = vsyncpa [#allocation13], 0 }
   0x8   :  { %20 = vsyncpa [#allocation16], 0 }
   0x9   :  { %21 = vsyncpa [#allocation19], 0 }
   0xa   :  { %22 = vsyncpa [#allocation22], 0 }
   0xb   :  { %23 = vsyncpa [#allocation8], 0 }
   0xc   :  { %25 = vsyncpa [#allocation8 + $0x1], 0  ;;  %s2095_s13 = smov 0   ;;  %s2097_s14 = smov 0  }
   0xd   :  { %s2099_s15 = smov 0   ;;  %s2101_s16 = smov 0  }
   0xe   :  { %s2103_s17 = smov 0   ;;  %s2105_s18 = smov 0  }
   0xf LB: > { %2594 = sst [smem:[#allocation31_spill]] %s2009_s16  ;;  %s2584_s19 = sadd.s32 4294967295, %s2017_s18   ;;  %s2017_s18 = sphi %s2105_s18, %s31_s18   ;;  %s2013_s17 = sphi %s2103_s17, %s2622_s17   ;;  %s2009_s16 = sphi %s2101_s16, %s2621_s16   ;;  %s2005_s15 = sphi %s2099_s15, %s2620_s15   ;;  %s2001_s14 = sphi %s2097_s14, %s2619_s14   ;;  %s1997_s13 = sphi %s2095_s13, %s2618_s13  }
  0x10   : > { %p1317_p0 = scmp.ge.s32.totalorder %s2017_s18, 1  ;;  %p2129_p1 = scmp.eq.s32.totalorder %s2584_s19, 0 }
  0x11   : > { %p291_p2 = scmp.lt.s32.totalorder %s2017_s18, 3  ;;  %s2019_s22 = smov [#allocation9]  }
  0x12   : > { %s2595_s20 = scalar_select %p2129_p1, 1, 0 }
  0x13   : > { %p2134_p3 = pnand %p1317_p0, %p291_p2  ;;  %s304_s23 = sshll.u32 %s2019_s22, 4  ;;  %s305_s23 = int_to_ptr.vmem [resolvable:$true] %s304_s23 }
  0x14   : > { %s2020_s24 = smov [#allocation12]   ;;  %s2021_s27 = smov [#allocation15]  }
  0x15   : > { %s2596_s21 = scalar_select %p2134_p3, 1, 0 }
  0x16   : > { %p1478_p5 = pneg %p2134_p3  ;;  %s325_s25 = sshll.u32 %s2020_s24, 4  ;;  %s2147_s25 = int_to_ptr.vmem [resolvable:$true] %s325_s25 }
  0x17   : > { %2597 = sst [smem:[#allocation32_spill]] %s2596_s21  ;;  %s2149_s28 = sshll.u32 %s2021_s27, 4  ;;  %s352_s28 = int_to_ptr.vmem [resolvable:$true] %s2149_s28 }
  0x18   : > { %p2143_p6 = pnand %p1478_p5, %p2129_p1  ;;  %s2599_s1 = sld [smem:[#allocation33_spill]] }
  0x1a   : > { %p2159_p8 = pneg %p2143_p6 }
  0x1e   : > { %s1633_s11 = scalar_lea.hbm %s2599_s1, 16 }
  0x1f   : > { %p1634_p7 = scmp.ne.s32.totalorder %s2599_s1, %s1633_s11  ;;  %p1640_p11 = scmp.lt.u32.totalorder %s1633_s11, %s2599_s1 }
  0x21   : > { %p1636_p9 = pnand %p2159_p8, %p1634_p7 }
  0x23   : > { %p1637_p10 = pneg %p1636_p9 }
  0x25   : > { %p1642_p12 = pnand %p1640_p11, %p1637_p10 }
  0x27   : > { %1645 = shalt.err (!%p1642_p12)
}
  0x28   : > { %s1646_s29 = scalar_lea.vmem %s305_s23, 16  ;;  %s1653_s30 = scalar_lea.vmem %s305_s23, 32 }
  0x29   : > { %p1647_p13 = scmp.ne.s32.totalorder %s305_s23, %s1646_s29  ;;  %p1654_p5 = scmp.lt.s32.totalorder %s305_s23, %s305_s23 }
  0x2a   : > { %p1655_p4 = scmp.lt.s32.totalorder %s1653_s30, %s1646_s29 }
  0x2b   : > { %p1649_p0 = pnand %p1647_p13, %p2159_p8 }
  0x2c   : > { %p1656_p3 = por %p1655_p4, %p1654_p5 }
  0x2d   : > { %p1650_p2 = pneg %p1649_p0 }
  0x2f   : > { %p1657_p1 = pnand %p1656_p3, %p1650_p2 }
  0x31   : > { %1660 = shalt.err (!%p1657_p1)
}
  0x32   : > { %1481 = dma.hbm_to_vmem [thread:$0]  (!%p2143_p6), %s2599_s1, 16, %s305_s23, [#allocation10]  }
  0x33   : > { %s2601_s3 = sld [smem:[#allocation34_spill]] }
  0x39   : > { %s1661_s27 = scalar_lea.hbm %s2601_s3, 256 }
  0x3a   : > { %p1662_p7 = scmp.ne.s32.totalorder %s2601_s3, %s1661_s27  ;;  %p1668_p1 = scmp.lt.u32.totalorder %s1661_s27, %s2601_s3 }
  0x3c   : > { %p1664_p9 = pnand %p1662_p7, %p2159_p8 }
  0x3e   : > { %p1665_p4 = pneg %p1664_p9 }
  0x40   : > { %p1670_p3 = pnand %p1668_p1, %p1665_p4 }
  0x42   : > { %1673 = shalt.err (!%p1670_p3)
}
  0x43   : > { %s1674_s23 = scalar_lea.vmem %s2147_s25, 256  ;;  %p1682_p13 = scmp.lt.s32.totalorder %s2147_s25, %s2147_s25 }
  0x44   : > { %p1675_p10 = scmp.ne.s32.totalorder %s2147_s25, %s1674_s23  ;;  %p1683_p0 = scmp.lt.s32.totalorder %s1674_s23, %s1674_s23 }
  0x46   : > { %p1677_p11 = pnand %p1675_p10, %p2159_p8  ;;  %p1684_p2 = por %p1683_p0, %p1682_p13 }
  0x48   : > { %p1678_p12 = pneg %p1677_p11 }
  0x4a   : > { %p1685_p5 = pnand %p1684_p2, %p1678_p12 }
  0x4c   : > { %1688 = shalt.err (!%p1685_p5)
}
  0x4d   : > { %s2022_s10 = smov 64   ;;  %s2023_s16 = smov 4  }
  0x4e   : > { %1487 = dma.hbm_to_vmem [thread:$0]  (!%p2143_p6), %s2601_s3, 256, %s2147_s25, [#allocation13], %s2022_s10, %s2022_s10, %s2023_s16  }
  0x4f   : > { %s1689_s27 = scalar_lea.hbm %s2578_s5, 256 }
  0x50   : > { %p1690_p7 = scmp.ne.s32.totalorder %s2578_s5, %s1689_s27  ;;  %p1696_p1 = scmp.lt.u32.totalorder %s1689_s27, %s2578_s5 }
  0x52   : > { %p1692_p9 = pnand %p1690_p7, %p2159_p8 }
  0x54   : > { %p1693_p4 = pneg %p1692_p9 }
  0x56   : > { %p1698_p3 = pnand %p1696_p1, %p1693_p4 }
  0x58   : > { %1701 = shalt.err (!%p1698_p3)
}
  0x59   : > { %s1702_s12 = scalar_lea.vmem %s352_s28, 256  ;;  %p1710_p13 = scmp.lt.s32.totalorder %s352_s28, %s352_s28 }
  0x5a   : > { %p1703_p10 = scmp.ne.s32.totalorder %s352_s28, %s1702_s12  ;;  %p1711_p0 = scmp.lt.s32.totalorder %s1702_s12, %s1702_s12 }
  0x5c   : > { %p1705_p11 = pnand %p1703_p10, %p2159_p8  ;;  %p1712_p2 = por %p1711_p0, %p1710_p13 }
  0x5e   : > { %p1706_p12 = pneg %p1705_p11 }
  0x60   : > { %p1713_p5 = pnand %p1712_p2, %p1706_p12 }
  0x62   : > { %1716 = shalt.err (!%p1713_p5)
}
  0x63   : > { %1493 = dma.hbm_to_vmem [thread:$0]  (!%p2143_p6), %s2578_s5, 256, %s352_s28, [#allocation16], %s2022_s10, %s2022_s10, %s2023_s16  }
  0x64   : > { %s2024_s22 = smov [#allocation18]   ;;  %s2025_s11 = smov [#allocation11]  }
  0x65   : > { %s376_s19 = sshll.u32 %s2024_s22, 4  ;;  %s315_s27 = sshll.u32 %s2025_s11, 4  ;;  %s377_s19 = int_to_ptr.vmem [resolvable:$true] %s376_s19  ;;  %s316_s27 = int_to_ptr.vmem [resolvable:$true] %s315_s27 }
  0x66   : > { %s1717_s23 = scalar_lea.hbm %s2580_s7, 16 }
  0x67   : > { %p1718_p7 = scmp.ne.s32.totalorder %s2580_s7, %s1717_s23  ;;  %p1724_p1 = scmp.lt.u32.totalorder %s1717_s23, %s2580_s7 }
  0x69   : > { %p1720_p9 = pnand %p1718_p7, %p2159_p8 }
  0x6b   : > { %p1721_p4 = pneg %p1720_p9 }
  0x6d   : > { %p1726_p3 = pnand %p1724_p1, %p1721_p4 }
  0x6f   : > { %1729 = shalt.err (!%p1726_p3)
}
  0x70   : > { %s1730_s28 = scalar_lea.vmem %s377_s19, 16  ;;  %s1737_s25 = scalar_lea.vmem %s377_s19, 32 }
  0x71   : > { %p1731_p10 = scmp.ne.s32.totalorder %s377_s19, %s1730_s28  ;;  %p1738_p13 = scmp.lt.s32.totalorder %s377_s19, %s377_s19 }
  0x72   : > { %p1739_p0 = scmp.lt.s32.totalorder %s1737_s25, %s1730_s28 }
  0x73   : > { %p1733_p11 = pnand %p1731_p10, %p2159_p8 }
  0x74   : > { %p1740_p2 = por %p1739_p0, %p1738_p13 }
  0x75   : > { %p1734_p12 = pneg %p1733_p11 }
  0x77   : > { %p1741_p5 = pnand %p1740_p2, %p1734_p12 }
  0x79   : > { %1744 = shalt.err (!%p1741_p5)
}
  0x7a   : > { %1499 = dma.hbm_to_vmem [thread:$0]  (!%p2143_p6), %s2580_s7, 16, %s377_s19, [#allocation19]  }
  0x7b   : > { %s1745_s29 = scalar_lea.hbm %s2575_s2, 16 }
  0x7c   : > { %p1746_p7 = scmp.ne.s32.totalorder %s2575_s2, %s1745_s29  ;;  %p1752_p1 = scmp.lt.u32.totalorder %s1745_s29, %s2575_s2 }
  0x7e   : > { %p1748_p9 = pnand %p1746_p7, %p2159_p8 }
  0x80   : > { %p1749_p4 = pneg %p1748_p9 }
  0x82   : > { %p1754_p3 = pnand %p1752_p1, %p1749_p4 }
  0x84   : > { %1757 = shalt.err (!%p1754_p3)
}
  0x85   : > { %s1758_s28 = scalar_lea.vmem %s316_s27, 16  ;;  %s1765_s19 = scalar_lea.vmem %s316_s27, 32 }
  0x86   : > { %p1759_p10 = scmp.ne.s32.totalorder %s316_s27, %s1758_s28  ;;  %p1766_p13 = scmp.lt.s32.totalorder %s316_s27, %s316_s27 }
  0x87   : > { %p1767_p0 = scmp.lt.s32.totalorder %s1765_s19, %s1758_s28 }
  0x88   : > { %p1761_p11 = pnand %p1759_p10, %p2159_p8 }
  0x89   : > { %p1768_p2 = por %p1767_p0, %p1766_p13 }
  0x8a   : > { %p1762_p12 = pneg %p1761_p11 }
  0x8c   : > { %p1769_p5 = pnand %p1768_p2, %p1762_p12 }
  0x8e   : > { %1772 = shalt.err (!%p1769_p5)
}
  0x8f   : > { %1484 = dma.hbm_to_vmem [thread:$0]  (!%p2143_p6), %s2575_s2, 16, %s316_s27, [#allocation10]  }
  0x90   : > { %s2026_s22 = smov [#allocation14]   ;;  %s2027_s11 = smov [#allocation17]  }
  0x91   : > { %s338_s21 = sshll.u32 %s2026_s22, 4  ;;  %s365_s29 = sshll.u32 %s2027_s11, 4  ;;  %s339_s21 = int_to_ptr.vmem [resolvable:$true] %s338_s21  ;;  %s366_s29 = int_to_ptr.vmem [resolvable:$true] %s365_s29 }
  0x92   : > { %s1773_s12 = scalar_lea.hbm %s2577_s4, 256 }
  0x93   : > { %p1774_p7 = scmp.ne.s32.totalorder %s2577_s4, %s1773_s12  ;;  %p1780_p1 = scmp.lt.u32.totalorder %s1773_s12, %s2577_s4 }
  0x95   : > { %p1776_p9 = pnand %p1774_p7, %p2159_p8 }
  0x97   : > { %p1777_p4 = pneg %p1776_p9 }
  0x99   : > { %p1782_p3 = pnand %p1780_p1, %p1777_p4 }
  0x9b   : > { %1785 = shalt.err (!%p1782_p3)
}
  0x9c   : > { %s1786_s27 = scalar_lea.vmem %s339_s21, 256  ;;  %p1794_p13 = scmp.lt.s32.totalorder %s339_s21, %s339_s21 }
  0x9d   : > { %p1787_p10 = scmp.ne.s32.totalorder %s339_s21, %s1786_s27  ;;  %p1795_p0 = scmp.lt.s32.totalorder %s1786_s27, %s1786_s27 }
  0x9f   : > { %p1789_p11 = pnand %p1787_p10, %p2159_p8  ;;  %p1796_p2 = por %p1795_p0, %p1794_p13 }
  0xa1   : > { %p1790_p12 = pneg %p1789_p11 }
  0xa3   : > { %p1797_p5 = pnand %p1796_p2, %p1790_p12 }
  0xa5   : > { %1800 = shalt.err (!%p1797_p5)
}
  0xa6   : > { %1490 = dma.hbm_to_vmem [thread:$0]  (!%p2143_p6), %s2577_s4, 256, %s339_s21, [#allocation13], %s2022_s10, %s2022_s10, %s2023_s16  }
  0xa7   : > { %s1801_s23 = scalar_lea.hbm %s2579_s6, 16 }
  0xa8   : > { %p1802_p7 = scmp.ne.s32.totalorder %s2579_s6, %s1801_s23  ;;  %p1808_p1 = scmp.lt.u32.totalorder %s1801_s23, %s2579_s6 }
  0xaa   : > { %p1804_p9 = pnand %p1802_p7, %p2159_p8 }
  0xac   : > { %p1805_p4 = pneg %p1804_p9 }
  0xae   : > { %p1810_p3 = pnand %p1808_p1, %p1805_p4 }
  0xb0   : > { %1813 = shalt.err (!%p1810_p3)
}
  0xb1   : > { %s1814_s25 = scalar_lea.vmem %s366_s29, 16  ;;  %s1821_s10 = scalar_lea.vmem %s366_s29, 32 }
  0xb2   : > { %p1815_p10 = scmp.ne.s32.totalorder %s366_s29, %s1814_s25  ;;  %p1822_p13 = scmp.lt.s32.totalorder %s366_s29, %s366_s29 }
  0xb3   : > { %p1823_p0 = scmp.lt.s32.totalorder %s1821_s10, %s1814_s25 }
  0xb4   : > { %p1817_p11 = pnand %p1815_p10, %p2159_p8 }
  0xb5   : > { %p1824_p2 = por %p1823_p0, %p1822_p13 }
  0xb6   : > { %p1818_p12 = pneg %p1817_p11 }
  0xb8   : > { %p1825_p5 = pnand %p1824_p2, %p1818_p12 }
  0xba   : > { %1828 = shalt.err (!%p1825_p5)
}
  0xbb   : > { %1496 = dma.hbm_to_vmem [thread:$0]  (!%p2143_p6), %s2579_s6, 16, %s366_s29, [#allocation16]  }
  0xbc   : > { %s2028_s27 = smov [#allocation20]   ;;  %s1829_s30 = scalar_lea.hbm %s2581_s8, 32 }
  0xbd   : > { %s386_s3 = sshll.u32 %s2028_s27, 4  ;;  %p1830_p7 = scmp.ne.s32.totalorder %s2581_s8, %s1829_s30  ;;  %s387_s3 = int_to_ptr.vmem [resolvable:$true] %s386_s3 }
  0xbe   : > { %p1836_p1 = scmp.lt.u32.totalorder %s1829_s30, %s2581_s8 }
  0xbf   : > { %p1832_p9 = pnand %p1830_p7, %p2159_p8 }
  0xc1   : > { %p1833_p4 = pneg %p1832_p9 }
  0xc3   : > { %p1838_p3 = pnand %p1836_p1, %p1833_p4 }
  0xc5   : > { %1841 = shalt.err (!%p1838_p3)
}
  0xc6   : > { %s1842_s29 = scalar_lea.vmem %s387_s3, 32  ;;  %p1850_p13 = scmp.lt.s32.totalorder %s387_s3, %s387_s3 }
  0xc7   : > { %p1843_p10 = scmp.ne.s32.totalorder %s387_s3, %s1842_s29  ;;  %p1851_p0 = scmp.lt.s32.totalorder %s1842_s29, %s1842_s29 }
  0xc9   : > { %p1845_p11 = pnand %p1843_p10, %p2159_p8  ;;  %p1852_p2 = por %p1851_p0, %p1850_p13 }
  0xcb   : > { %p1846_p12 = pneg %p1845_p11 }
  0xcd   : > { %p1853_p5 = pnand %p1852_p2, %p1846_p12 }
  0xcf   : > { %1856 = shalt.err (!%p1853_p5)
}
  0xd0   : > { %s2029_s19 = smov 16   ;;  %s2030_s25 = smov 1  }
  0xd1   : > { %1502 = dma.hbm_to_vmem [thread:$0]  (!%p2143_p6), %s2581_s8, 32, %s387_s3, [#allocation19], %s2029_s19, %s2029_s19, %s2030_s25  }
  0xd2   : > { %s2031_s21 = smov [#allocation21]   ;;  %s1857_s30 = scalar_lea.hbm %s2582_s9, 32 }
  0xd3   : > { %s399_s27 = sshll.u32 %s2031_s21, 4  ;;  %p1858_p7 = scmp.ne.s32.totalorder %s2582_s9, %s1857_s30  ;;  %s400_s27 = int_to_ptr.vmem [resolvable:$true] %s399_s27 }
  0xd4   : > { %p1864_p1 = scmp.lt.u32.totalorder %s1857_s30, %s2582_s9 }
  0xd5   : > { %p1860_p9 = pnand %p1858_p7, %p2159_p8 }
  0xd7   : > { %p1861_p4 = pneg %p1860_p9 }
  0xd9   : > { %p1866_p3 = pnand %p1864_p1, %p1861_p4 }
  0xdb   : > { %1869 = shalt.err (!%p1866_p3)
}
  0xdc   : > { %s1870_s3 = scalar_lea.vmem %s400_s27, 32  ;;  %p1878_p13 = scmp.lt.s32.totalorder %s400_s27, %s400_s27 }
  0xdd   : > { %p1871_p10 = scmp.ne.s32.totalorder %s400_s27, %s1870_s3  ;;  %p1879_p0 = scmp.lt.s32.totalorder %s1870_s3, %s1870_s3 }
  0xdf   : > { %p1873_p11 = pnand %p1871_p10, %p2159_p8  ;;  %p1880_p2 = por %p1879_p0, %p1878_p13 }
  0xe1   : > { %p1874_p12 = pneg %p1873_p11 }
  0xe3   : > { %p1881_p5 = pnand %p1880_p2, %p1874_p12 }
  0xe5   : > { %1884 = shalt.err (!%p1881_p5)
}
  0xe6   : > { %1505 = dma.hbm_to_vmem [thread:$0]  (!%p2143_p6), %s2582_s9, 32, %s400_s27, [#allocation22], %s2029_s19, %s2029_s19, %s2030_s25  }
  0xe7   : > { %s1316_s24 = sadd.s32 4294967294, %s2017_s18   ;;  %s43_s16 = sadd.s32 1, %s2013_s17 }
  0xe8   : > { %s50_s26 = sadd.s32 1, %s2005_s15  ;;  %p45_p8 = scmp.ge.s32.totalorder %s43_s16, 2 }
  0xe9   : > { %p57_p7 = scmp.ne.s32.totalorder %s2005_s15, %s2001_s14  ;;  %p58_p9 = scmp.eq.s32.totalorder %s2017_s18, 0 }
  0xea   : > { %p63_p4 = scmp.ne.s32.totalorder %s2001_s14, %s1997_s13  ;;  %s2624_s16 = smov (%p45_p8, %s43_s16), 0 }
  0xeb   : > { %p2344_p1 = por %p58_p9, %p57_p7  ;;  %p2603_p3 = scmp.ne.s32.totalorder %s2595_s20, 0 }
  0xec   : > { %s47_s25 = ssub.s32 %s2013_s17, %s2624_s16  ;;  %s2605_s27 = sadd.s32 4294967295, %s2017_s18  }
  0xed   : > { %p2350_p6 = por %p2603_p3, %p63_p4  ;;  %p278_p10 = scmp.eq.s32.totalorder %s2605_s27, 1 }
  0xee   : > { %p48_p11 = scmp.eq.s32.totalorder %s47_s25, 0  ;;  %p284_p12 = scmp.eq.s32.totalorder %s1316_s24, 1 }
  0xef   : > { %p2358_p13 = por %p278_p10, %p57_p7  ;;  %p1523_p0 = scmp.lt.s32.totalorder %s2017_s18, 2 }
  0xf0   : > { %s2364_s11 = scalar_select %p48_p11, %s2005_s15, %s50_s26  }
  0xf1   : > { %s2606_s22 = scalar_select %p2358_p13, 1, 0 }
  0xf2   : > { %p2366_p2 = por %p284_p12, %p63_p4  ;;  %s413_s23 = sand.u32 1, %s2005_s15  }
  0xf3   : > { %s1328_s12 = sshll.u32 %s413_s23, 3  ;;  %s1329_s1 = sshll.u32 %s2013_s17, 7 }
  0xf4   : > { %s2607_s30 = scalar_select %p2366_p2, 1, 0 }
  0xf5   : > { %s2375_s29 = scalar_lea.hbm %s2573_s0, %s1329_s1  ;;  %s417_s10 = scalar_lea.vmem [#allocation6], %s1328_s12 }
  0xf6   : > { %s424_s24 = sshll.u32 %s417_s10, 4  ;;  %p2381_p5 = pnand %p1523_p0, %p2344_p1  ;;  %s2377_s24 = int_to_ptr.vmem [resolvable:$true] %s424_s24 }
  0xf7   : > { %s414_s25 = scalar_lea.sflag [#allocation7], %s413_s23  ;;  %s1885_s27 = scalar_lea.hbm %s2375_s29, 128 }
  0xf8   : > { %p1886_p8 = scmp.ne.s32.totalorder %s2375_s29, %s1885_s27  ;;  %p1887_p7 = pneg %p2381_p5 }
  0xf9   : > { %s1890_s28 = scalar_lea.hbm %s2573_s0, 256  ;;  %p1891_p1 = scmp.lt.u32.totalorder %s2375_s29, %s2573_s0 }
  0xfa   : > { %p1888_p9 = pnand %p1887_p7, %p1886_p8  ;;  %p1892_p3 = scmp.lt.u32.totalorder %s1890_s28, %s1885_s27 }
  0xfb   : > { %p1894_p11 = scmp.lt.u32.totalorder %s1885_s27, %s2375_s29 }
  0xfc   : > { %p1889_p4 = pneg %p1888_p9  ;;  %p1893_p10 = por %p1892_p3, %p1891_p1 }
  0xfe   : > { %p1895_p12 = por %p1894_p11, %p1893_p10 }
 0x100   : > { %p1896_p0 = pnand %p1895_p12, %p1889_p4 }
 0x102   : > { %1899 = shalt.err (!%p1896_p0)
}
 0x103   : > { %s1900_s23 = scalar_lea.vmem %s2377_s24, 128  ;;  %s2032_s10 = smov [#allocation6]  }
 0x104   : > { %p1901_p8 = scmp.ne.s32.totalorder %s2377_s24, %s1900_s23  ;;  %s1905_s12 = sshll.u32 %s2032_s10, 4  ;;  %s1906_s12 = int_to_ptr.vmem [resolvable:$false] %s1905_s12 }
 0x105   : > { %s1907_s1 = scalar_lea.vmem %s1906_s12, 256  ;;  %p1908_p13 = scmp.lt.s32.totalorder %s2377_s24, %s1906_s12 }
 0x106   : > { %p1903_p9 = pnand %p1901_p8, %p1887_p7  ;;  %p1909_p1 = scmp.lt.s32.totalorder %s1907_s1, %s1900_s23 }
 0x108   : > { %p1904_p2 = pneg %p1903_p9  ;;  %p1910_p3 = por %p1909_p1, %p1908_p13 }
 0x10a   : > { %p1911_p10 = pnand %p1910_p3, %p1904_p2 }
 0x10c   : > { %1914 = shalt.err (!%p1911_p10)
}
 0x10d   : > { %1509 = dma.hbm_to_vmem [thread:$0]  (!%p2381_p5), %s2375_s29, 128, %s2377_s24, %s414_s25  }
 0x10e   : > { %s2609_s27 = sld [smem:[#allocation32_spill]] }
 0x114   : > { %p2610_p4 = scmp.ne.s32.totalorder %s2609_s27, 0 }
 0x115   : > { %s2413_s28 = sand.u32 (!%p2610_p4), 1, %s2001_s14  }
 0x116   : > { %433 = sbr.rel (%p2610_p4) target bundleno = 2182 (0x886), region = 60  ;;  %s1331_s21 = sshll.u32 (!%p2610_p4), %s2413_s28, 3 }
 0x117   : > { %s436_s3 = scalar_lea.sflag (!%p2610_p4), [#allocation7], %s2413_s28  ;;  %s439_s23 = scalar_lea.vmem (!%p2610_p4), [#allocation6], %s1331_s21 }
 0x11d   : > { %1968 = dma.done.wait (%p2350_p6), %s436_s3, 128  }
 0x11e   : > { %1970 = vsyncadd (%p2350_p6), %s436_s3, 4294967168  ;;  %p2611_p13 = scmp.ne.s32.totalorder %s2595_s20, 0 }
 0x120   : > { %1972 = dma.done.wait (%p2611_p13), [#allocation10], 32  }
 0x121   : > { %1974 = vsyncadd (%p2611_p13), [#allocation10], 4294967264 }
 0x122   : > { %1976 = dma.done.wait (%p2611_p13), [#allocation13], 512  }
 0x123   : > { %1978 = vsyncadd (%p2611_p13), [#allocation13], 4294966784 }
 0x124   : > { %1980 = dma.done.wait (%p2611_p13), [#allocation16], 272  }
 0x125   : > { %1982 = vsyncadd (%p2611_p13), [#allocation16], 4294967024 }
 0x126   : > { %1984 = dma.done.wait (%p2611_p13), [#allocation19], 48  }
 0x127   : > { %1986 = vsyncadd (%p2611_p13), [#allocation19], 4294967248 }
 0x128   : > { %1988 = dma.done.wait (%p2611_p13), [#allocation22], 32  }
 0x129   : > { %1990 = vsyncadd (%p2611_p13), [#allocation22], 4294967264  ;;  %vm518_vm0 = vcmask 261120   ;;  %v517_v0 = vld [vmem:[%s439_s23] sm:$0xff]  ;;  %v1601_v7 = vld [vmem:[#allocation12] sm:$0xff]   ;;  %v2033_v9 = vmov 0.0   ;;  %v677_v37 = vlaneseq }
 0x12a   : > { %v519_v1 = vsel %vm518_vm0, %v517_v0, 0.0  ;;  %v1602_v8 = vld [vmem:[#allocation14] sm:$0xff]   ;;  %1390 = vmatprep.subr.bf16.mxu0 %v2033_v9  ;;  %1398 = vmatprep.subr.bf16.mxu1 %v2033_v9  ;;  %v1603_v10 = vld [vmem:[#allocation12 + $0x8] sm:$0xff]   ;;  %v1604_v11 = vld [vmem:[#allocation14 + $0x8] sm:$0xff]   ;;  %vm2034_vm1 = vmmov 0   ;;  %s2035_s20 = smov 112  }
 0x12b   : > { %520 = vadd.xlane.f32.xlu0 %v519_v1  ;;  %1391 = vmatpush3.bf16.msra.mxu0 %v1601_v7  ;;  %v1342_v16 = vld [vmem:[#allocation9] ss:$0 sm:$0xff]  ;;  %v1343_v18 = vld [vmem:[#allocation11] ss:$0 sm:$0xff]  ;;  %vm668_vm2 = vcmask 130048   ;;  %v678_v38 = vshrl.u32 %v677_v37, 7 }
 0x12c   : > { %1399 = vmatpush3.bf16.msra.mxu1 %v1602_v8  ;;  %1392 = vmatprep.subr.bf16.mxu0 %v2033_v9  ;;  %v665_v39 = vld [vmem:[#allocation17] sm:$0x1]  ;;  %v1350_v42 = vld [vmem:[#allocation18] ss:$0 sm:$0xff]  ;;  %s2036_s19 = smov 16   ;;  %vm768_vm3 = vcmask 122880  }
 0x12d   : > { %1400 = vmatprep.subr.bf16.mxu1 %v2033_v9  ;;  %1394 = vmatprep.mubr.msk.bf16.mxu0 %vm2034_vm1, %v2033_v9  ;;  %v675_v40 = vmul.f32 8.0, %v665_v39  ;;  %v2470_v41 = vsub.s32 0, %v678_v38  ;;  %v762_v44 = vld [vmem:[#allocation20] sm:$0x1]  ;;  %vm684_vm4 = vcmask 125952   ;;  %s2037_s29 = smov 80  }
 0x12e   : > { %1402 = vmatprep.mubr.msk.bf16.mxu1 %vm2034_vm1, %v2033_v9  ;;  %v766_v45 = vmul.f32 %v762_v44, %v762_v44  ;;  %vm849_vm5 = vcmask 64512   ;;  %s2038_s24 = smov 96   ;;  %vm875_vm6 = vcmask 1043456   ;;  %s2612_s26 = sld [smem:[#allocation31_spill]]  ;;  %vm1066_vm7 = vcmask 257152  }
 0x12f   : > { %1393 = vmatpush3.bf16.msra.mxu0 %v1603_v10  ;;  %v680_v43 = vrot.slane %v675_v40, %v2470_v41  ;;  %s511_s10 = scalar_lea.vmem [#allocation23], %s1331_s21  ;;  %s2613_s3 = sld [smem:[#allocation35_spill]] }
 0x130   : > { %1401 = vmatpush3.bf16.msra.mxu1 %v1604_v11  ;;  %1406 = vmatprep.subr.bf16.mxu0 %v2033_v9  ;;  %v769_v47 = vsel %vm768_vm3, %v766_v45, 0.0  ;;  %s1145_s12 = sshll.u32 %s511_s10, 4  ;;  %p2614_p2 = scmp.ne.s32.totalorder %s2606_s22, 0  ;;  %s2525_s12 = int_to_ptr.vmem [resolvable:$true] %s1145_s12 }
 0x131   : > { %1412 = vmatprep.subr.bf16.mxu1 %v2033_v9  ;;  %s2039_s21 = smov [#allocation23]  }
 0x134   : > { %s1366_s25 = sshll.u32 %s2612_s26, 7 }
 0x135   : > { %s2523_s23 = scalar_lea.hbm %s2613_s3, %s1366_s25 }
 0x1b8   : > { %v521_v2 = vpop.xlane.xlu0 %520 }
 0x1b9   : > { %v523_v3 = vmul.f32 0.03125, %v521_v2 }
 0x1bb   : > { %v524_v4 = vsub.f32 %v517_v0, %v523_v3 }
 0x1bd   : > { %v525_v5 = vmul.f32 %v524_v4, %v524_v4 }
 0x1bf   : > { %v526_v6 = vsel %vm518_vm0, %v525_v5, 0.0 }
 0x1c0   : > { %527 = vadd.xlane.f32.xlu0 %v526_v6 }
 0x24d   : > { %v528_v12 = vpop.xlane.xlu0 %527 }
 0x24e   : > { %v529_v13 = vmul.f32 0.03125, %v528_v12 }
 0x250   : > { %v530_v14 = vadd.f32 1e-05, %v529_v13 }
 0x252   : > { %1607 = vrsqrt.f32 %v530_v14 }
 0x25c   : > { %v1608_v15 = vpop.eup %1607 }
 0x25d   : > { %v532_v17 = vmul.f32 %v1608_v15, %v524_v4  ;;  %v763_v4 = vld [vmem:[#allocation20 + $0x1] sm:$0x1] }
 0x25e   : > { %v767_v5 = vmul.f32 %v763_v4, %v763_v4 }
 0x25f   : > { %v540_v19 = vmul.f32 %v1342_v16, %v532_v17  ;;  %v761_v16 = vld [vmem:[#allocation18] sm:$0x1] }
 0x260   : > { %v772_v7 = vsel %vm768_vm3, %v767_v5, 0.0 }
 0x261   : > { %v548_v20 = vadd.f32 %v1343_v18, %v540_v19 }
 0x263   : > { %v549_v21 = vpack.c.bf16 %v548_v20, %v548_v20 }
 0x265   : > { %1395 = vmatmul.mubr.msk.bf16.vlgmr.msra.gmra.mrb[0].mxu0 %vm518_vm0, %v549_v21  ;;  %1403 = vmatmul.mubr.msk.bf16.vlgmr.msra.gmra.mrb[0].mxu1 %vm518_vm0, %v549_v21 }
 0x266   : > { %1408 = vmatprep.mubr.msk.bf16.mxu0 %vm2034_vm1, %v2033_v9  ;;  %1414 = vmatprep.mubr.msk.bf16.mxu1 %vm2034_vm1, %v2033_v9 }
 0x338   : > { %v603_v22 = vpop.f32.mrb[0].mxu0  ;;  %v2461_v23 = vpop.f32.mrb[0].mxu1 }
 0x339   : > { %v1396_v24 = vpop.f32.mrb[1].mxu0  ;;  %v1404_v25 = vpop.f32.mrb[1].mxu1  ;;  %v686_v26 = vmul.f32 %v2461_v23, %v2461_v23  ;;  %v667_v31 = vmul.f32 %v603_v22, %v603_v22  ;;  %v1369_v18 = vpack.c.bf16 %v2461_v23, %v2461_v23 }
 0x33a   : > { %v606_v27 = vpop.f32.mrb[2].mxu0  ;;  %v662_v28 = vpop.f32.mrb[2].mxu1 }
 0x33b   : > { %734 = vrot.lane.b32.xlu1 %v686_v26, %s2035_s20  ;;  %v1397_v29 = vpop.f32.mrb[3].mxu0  ;;  %v1405_v30 = vpop.f32.mrb[3].mxu1  ;;  %v669_v36 = vsel %vm668_vm2, %v667_v31, 0.0  ;;  %v687_v46 = vsel %vm668_vm2, %v686_v26, 0.0 }
 0x33f   : > { %711 = vrot.lane.b32.xlu1 %v667_v31, %s2035_s20 }
 0x3ad   : > { %v735_v32 = vpop.permute.xlu1 %734 }
 0x3ae   : > { %v737_v33 = vsel %vm668_vm2, %v735_v32, 0.0 }
 0x3af   : > { %738 = vadd.xlane.f32.xlu0 %v737_v33 }
 0x3b1   : > { %v712_v34 = vpop.permute.xlu1 %711 }
 0x3b2   : > { %v714_v35 = vsel %vm668_vm2, %v712_v34, 0.0 }
 0x3b3   : > { %715 = vadd.xlane.f32.xlu1 %v714_v35 }
 0x3b7   : > { %670 = vadd.xlane.f32.xlu1 %v669_v36 }
 0x3c5   : > { %743 = vrot.lane.b32.xlu0 %v1350_v42, %s2036_s19 }
 0x3c9   : > { %720 = vrot.lane.b32.xlu0 %v680_v43, %s2036_s19 }
 0x3e8   : > { %688 = vadd.xlane.f32.xlu0 %v687_v46 }
 0x3ec   : > { %770 = vadd.xlane.f32.xlu0 %v769_v47 }
 0x43c   : > { %v739_v48 = vpop.xlane.xlu0 %738 }
 0x43d   : > { %v740_v49 = vmax.f32 %v739_v48, 1e-24 }
 0x43f   : > { %1609 = vrsqrt.f32 %v740_v49 }
 0x440   : > { %v716_v50 = vpop.xlane.xlu1 %715  ;;  %v744_v54 = vpop.permute.xlu0 %743 }
 0x441   : > { %v717_v51 = vmax.f32 %v716_v50, 1e-24 }
 0x443   : > { %1611 = vrsqrt.f32 %v717_v51 }
 0x444   : > { %v671_v52 = vpop.xlane.xlu1 %670  ;;  %v721_v59 = vpop.permute.xlu0 %720 }
 0x445   : > { %v672_v53 = vmax.f32 %v671_v52, 1e-24 }
 0x447   : > { %1613 = vrsqrt.f32 %v672_v53 }
 0x449   : > { %v1610_v55 = vpop.eup %1609 }
 0x44a   : > { %v742_v56 = vmul.f32 %v1610_v55, %v2461_v23 }
 0x44c   : > { %v746_v57 = vmul.f32 %v744_v54, %v742_v56 }
 0x44d   : > { %v1612_v58 = vpop.eup %1611 }
 0x44e   : > { %v1371_v60 = vpack.c.bf16 %v746_v57, %v746_v57  ;;  %v719_v61 = vmul.f32 %v1612_v58, %v603_v22 }
 0x450   : > { %v723_v62 = vmul.f32 %v721_v59, %v719_v61  ;;  %751 = vrot.lane.b32.xlu1 %v1371_v60, %s2035_s20 }
 0x451   : > { %v1614_v63 = vpop.eup %1613 }
 0x452   : > { %v674_v0 = vmul.f32 %v1614_v63, %v603_v22  ;;  %v1370_v1 = vpack.c.bf16 %v723_v62, %v723_v62 }
 0x454   : > { %v682_v2 = vmul.f32 %v680_v43, %v674_v0  ;;  %728 = vrot.lane.b32.xlu1 %v1370_v1, %s2035_s20  ;;  %s1131_s20 = scalar_lea.sflag [#allocation8], %s2413_s28 }
 0x456   : > { %v683_v3 = vpack.c.bf16 %v682_v2, %v682_v2 }
 0x458   : > { %685 = vst.msk [vmem:[#allocation2] sm:$0xf] %vm684_vm4, %v683_v3 }
 0x45f   : > { %v788_v20 = vld [vmem:[#allocation2] sm:$0xf] }
 0x460   : > { %v838_v22 = vunpack.c.l.bf16 %v788_v20 }
 0x475   : > { %v689_v6 = vpop.xlane.xlu0 %688 }
 0x476   : > { %v690_v8 = vmax.f32 %v689_v6, 1e-24 }
 0x478   : > { %1615 = vrsqrt.f32 %v690_v8  ;;  %773 = vadd.xlane.f32.xlu1 %v772_v7 }
 0x479   : > { %v771_v10 = vpop.xlane.xlu0 %770 }
 0x47a   : > { %v775_v11 = vmax.f32 %v771_v10, 1e-24 }
 0x47c   : > { %1617 = vrsqrt.f32 %v775_v11 }
 0x482   : > { %v1616_v12 = vpop.eup %1615 }
 0x483   : > { %v692_v13 = vmul.f32 %v1616_v12, %v2461_v23 }
 0x485   : > { %v699_v14 = vmul.f32 %v1350_v42, %v692_v13 }
 0x486   : > { %v1618_v15 = vpop.eup %1617 }
 0x487   : > { %v700_v17 = vpack.c.bf16 %v699_v14, %v699_v14  ;;  %v779_v19 = vmul.f32 %v1618_v15, %v762_v44 }
 0x489   : > { %701 = vst.msk [vmem:[#allocation3] sm:$0xf] %vm684_vm4, %v700_v17  ;;  %756 = vrot.lane.b32.xlu1 %v1369_v18, %s2037_s29  ;;  %v781_v21 = vmul.f32 %v779_v19, %v761_v16  ;;  %s1919_s29 = sshll.u32 %s2039_s21, 4  ;;  %s1920_s29 = int_to_ptr.vmem [resolvable:$false] %s1919_s29 }
 0x48a   : > { %p1922_p11 = scmp.lt.s32.totalorder %s2525_s12, %s1920_s29 }
 0x48b   : > { %v843_v24 = vrot.slane %v781_v21, %v2470_v41  ;;  %v1355_v21 = vld [vmem:[#allocation21] ss:$0 sm:$0xff] }
 0x48d   : > { %v845_v25 = vmul.f32 %v843_v24, %v838_v22 }
 0x48f   : > { %v846_v26 = vsel %vm668_vm2, %v845_v25, 0.0 }
 0x490   : > { %847 = vadd.xlane.f32.xlu0 %v846_v26  ;;  %v789_v27 = vld [vmem:[#allocation3] sm:$0xf] }
 0x491   : > { %v796_v28 = vsel %vm668_vm2, %v789_v27, 0 }
 0x492   : > { %1407 = vmatpush3.bf16.xpose.msra.mxu0 %v796_v28 }
 0x493   : > { %1418 = vmatprep.subr.bf16.mxu0 %v2033_v9 }
 0x499   : > { %1409 = vmatmul.mubr.msk.bf16.vlgmr.msra.gmra.mrb[4].mxu0 %vm668_vm2, %v788_v20 }
 0x49a   : > { %1420 = vmatprep.mubr.msk.bf16.mxu0 %vm2034_vm1, %v2033_v9 }
 0x4c2   : > { %v752_v23 = vpop.permute.xlu1 %751 }
 0x4c3   : > { %755 = vst.msk [vmem:[#allocation3 + $0x4] sm:$0xf] %vm684_vm4, %v752_v23  ;;  %v1605_v23 = vld [vmem:[#allocation15] sm:$0xff]  }
 0x4c6   : > { %v729_v29 = vpop.permute.xlu1 %728 }
 0x4c7   : > { %732 = vst.msk [vmem:[#allocation2 + $0x4] sm:$0xf] %vm684_vm4, %v729_v29 }
 0x4ca   : > { %v929_v30 = vld [vmem:[#allocation3 + $0x4] sm:$0xf] }
 0x4cb   : > { %v936_v31 = vsel %vm668_vm2, %v929_v30, 0 }
 0x4cc   : > { %1419 = vmatpush3.bf16.xpose.msra.mxu0 %v936_v31  ;;  %v1359_v31 = vld [vmem:[#allocation21 + $0x1] ss:$0 sm:$0xff] }
 0x4cd   : > { %1430 = vmatprep.subr.bf16.mxu0 %v2033_v9 }
 0x4ce   : > { %v1357_v32 = vld [vmem:[#allocation2 + $0x4] sm:$0xf] }
 0x4cf   : > { %v978_v39 = vunpack.c.l.bf16 %v1357_v32 }
 0x4d3   : > { %1421 = vmatmul.mubr.msk.bf16.vlgmr.msra.gmra.mrb[8].mxu0 %vm668_vm2, %v1357_v32  ;;  %v1606_v32 = vld [vmem:[#allocation15 + $0x8] sm:$0xff]  }
 0x4d4   : > { %1434 = vmatprep.mubr.msk.bf16.mxu0 %vm2034_vm1, %v2033_v9  ;;  %1431 = vmatpush3.bf16.msra.mxu0 %v1605_v23 }
 0x4d5   : > { %1432 = vmatprep.subr.bf16.mxu0 %v2033_v9 }
 0x4d8   : > { %1433 = vmatpush3.bf16.msra.mxu0 %v1606_v32 }
 0x505   : > { %v774_v33 = vpop.xlane.xlu1 %773 }
 0x506   : > { %v776_v34 = vmax.f32 %v774_v33, 1e-24 }
 0x508   : > { %1619 = vrsqrt.f32 %v776_v34 }
 0x509   : > { %v757_v35 = vpop.permute.xlu1 %756 }
 0x50a   : > { %760 = vst.msk [vmem:[#allocation4 + $0x4] sm:$0xf] %vm684_vm4, %v757_v35 }
 0x511   : > { %v931_v6 = vld [vmem:[#allocation4 + $0x4] sm:$0xf] }
 0x512   : > { %v1620_v36 = vpop.eup %1619  ;;  %v1015_v10 = vsel %vm875_vm6, %v931_v6, 0 }
 0x513   : > { %v780_v37 = vmul.f32 %v1620_v36, %v763_v4 }
 0x515   : > { %v782_v38 = vmul.f32 %v780_v37, %v761_v16 }
 0x517   : > { %v983_v40 = vrot.slane %v782_v38, %v2470_v41 }
 0x519   : > { %v985_v42 = vmul.f32 %v983_v40, %v978_v39 }
 0x51b   : > { %v986_v48 = vsel %vm668_vm2, %v985_v42, 0.0 }
 0x51d   : > { %v848_v41 = vpop.xlane.xlu0 %847 }
 0x56c   : > { %v832_v43 = vpop.f32.mrb[4].mxu0 }
 0x56d   : > { %v1410_v44 = vpop.f32.mrb[5].mxu0  ;;  %v850_v45 = vsel %vm849_vm5, %v832_v43, -inf }
 0x56e   : > { %851 = vmax.xlane.f32.xlu0 %v850_v45  ;;  %v835_v46 = vpop.f32.mrb[6].mxu0 }
 0x56f   : > { %v1411_v47 = vpop.f32.mrb[7].mxu0 }
 0x572   : > { %987 = vadd.xlane.f32.xlu0 %v986_v48 }
 0x5a6   : > { %v972_v49 = vpop.f32.mrb[8].mxu0 }
 0x5a7   : > { %v1422_v50 = vpop.f32.mrb[9].mxu0  ;;  %v989_v51 = vsel %vm849_vm5, %v972_v49, -inf }
 0x5a8   : > { %990 = vmax.xlane.f32.xlu0 %v989_v51  ;;  %v975_v52 = vpop.f32.mrb[10].mxu0 }
 0x5a9   : > { %v1423_v53 = vpop.f32.mrb[11].mxu0 }
 0x5be   : > { %706 = vrot.lane.b32.xlu0 %v1369_v18, %s2038_s24  ;;  %s1921_s24 = scalar_lea.vmem %s1920_s29, 256 }
 0x5fb   : > { %v852_v54 = vpop.xlane.xlu0 %851 }
 0x5fc   : > { %v853_v55 = vmax.f32 %v852_v54, %v848_v41 }
 0x5fe   : > { %v854_v56 = vsub.f32 %v832_v43, %v853_v55  ;;  %v857_v57 = vsub.f32 %v848_v41, %v853_v55 }
 0x5ff   : > { %v988_v61 = vpop.xlane.xlu0 %987 }
 0x600   : > { %v855_v58 = vmul.f32 1.442695, %v854_v56  ;;  %v858_v13 = vmul.f32 1.442695, %v857_v57 }
 0x602   : > { %1621 = vpow2.f32 %v855_v58 }
 0x60c   : > { %v1622_v59 = vpop.eup %1621 }
 0x60d   : > { %v860_v60 = vsel %vm849_vm5, %v1622_v59, 0.0  ;;  %v864_v7 = vpack.c.bf16 %v1622_v59, %v1622_v59 }
 0x60e   : > { %861 = vadd.xlane.f32.xlu1 %v860_v60 }
 0x635   : > { %v991_v62 = vpop.xlane.xlu0 %990 }
 0x636   : > { %v992_v63 = vmax.f32 %v991_v62, %v988_v61 }
 0x638   : > { %v993_v0 = vsub.f32 %v972_v49, %v992_v63  ;;  %v996_v1 = vsub.f32 %v988_v61, %v992_v63 }
 0x639   : > { %v707_v2 = vpop.permute.xlu0 %706 }
 0x63a   : > { %v994_v3 = vmul.f32 1.442695, %v993_v0  ;;  %709 = vst.msk [vmem:[#allocation4] sm:$0xf] %vm684_vm4, %v707_v2  ;;  %v997_v14 = vmul.f32 1.442695, %v996_v1 }
 0x63c   : > { %1623 = vpow2.f32 %v994_v3 }
 0x63d   : > { %1625 = vpow2.f32 %v858_v13 }
 0x63e   : > { %1627 = vpow2.f32 %v997_v14 }
 0x641   : > { %v790_v4 = vld [vmem:[#allocation4] sm:$0xf] }
 0x642   : > { %v877_v5 = vsel %vm875_vm6, %v790_v4, 0 }
 0x643   : > { %1413 = vmatpush3.bf16.msra.mxu1 %v877_v5 }
 0x644   : > { %1424 = vmatprep.subr.bf16.mxu1 %v2033_v9 }
 0x646   : > { %v1624_v8 = vpop.eup %1623  ;;  %1415 = vmatmul.mubr.msk.bf16.vlgmr.msra.gmra.mrb[4].mxu1 %vm849_vm5, %v864_v7 }
 0x647   : > { %1425 = vmatpush3.bf16.msra.mxu1 %v1015_v10  ;;  %v999_v11 = vsel %vm849_vm5, %v1624_v8, 0.0  ;;  %1426 = vmatprep.mubr.msk.bf16.mxu1 %vm2034_vm1, %v2033_v9  ;;  %v1003_v12 = vpack.c.bf16 %v1624_v8, %v1624_v8  ;;  %v1626_v16 = vpop.eup %1625 }
 0x648   : > { %1000 = vadd.xlane.f32.xlu0 %v999_v11  ;;  %v1628_v19 = vpop.eup %1627  ;;  %v871_v22 = vmul.f32 %v1626_v16, %v1355_v21 }
 0x649   : > { %v1010_v34 = vmul.f32 %v1628_v19, %v1359_v31 }
 0x64e   : > { %1427 = vmatmul.mubr.msk.bf16.vlgmr.msra.gmra.mrb[8].mxu1 %vm849_vm5, %v1003_v12 }
 0x69b   : > { %v862_v15 = vpop.xlane.xlu1 %861 }
 0x69c   : > { %v863_v17 = vadd.f32 %v1626_v16, %v862_v15 }
 0x69e   : > { %1629 = vrcp.f32 %v863_v17 }
 0x6a8   : > { %v1630_v27 = vpop.eup %1629 }
 0x6d5   : > { %v1001_v18 = vpop.xlane.xlu0 %1000 }
 0x6d6   : > { %v1002_v20 = vadd.f32 %v1628_v19, %v1001_v18 }
 0x6d8   : > { %1631 = vrcp.f32 %v1002_v20 }
 0x6e2   : > { %v1632_v38 = vpop.eup %1631 }
 0x719   : > { %v913_v24 = vpop.f32.mrb[4].mxu1 }
 0x71a   : > { %v914_v25 = vadd.f32 %v913_v24, %v871_v22  ;;  %v1416_v26 = vpop.f32.mrb[5].mxu1 }
 0x71b   : > { %v916_v28 = vpop.f32.mrb[6].mxu1 }
 0x71c   : > { %v920_v29 = vmul.f32 %v1630_v27, %v914_v25  ;;  %v1417_v30 = vpop.f32.mrb[7].mxu1 }
 0x71e   : > { %v921_v33 = vpack.c.bf16 %v920_v29, %v920_v29 }
 0x720   : > { %923 = vst.msk [vmem:[#allocation5] sm:$0xf] %vm684_vm4, %v921_v33 }
 0x721   : > { %v1051_v35 = vpop.f32.mrb[8].mxu1 }
 0x722   : > { %v1052_v36 = vadd.f32 %v1051_v35, %v1010_v34  ;;  %v1428_v37 = vpop.f32.mrb[9].mxu1 }
 0x723   : > { %v1054_v39 = vpop.f32.mrb[10].mxu1 }
 0x724   : > { %v1058_v40 = vmul.f32 %v1632_v38, %v1052_v36  ;;  %v1429_v42 = vpop.f32.mrb[11].mxu1 }
 0x726   : > { %v1372_v43 = vpack.c.bf16 %v1058_v40, %v1058_v40 }
 0x728   : > { %1063 = vrot.lane.b32.xlu0 %v1372_v43, %s2036_s19  ;;  %s1915_s19 = scalar_lea.vmem %s2525_s12, 128 }
 0x729   : > { %p1916_p6 = scmp.ne.s32.totalorder %s2525_s12, %s1915_s19  ;;  %p1923_p12 = scmp.lt.s32.totalorder %s1921_s24, %s1915_s19 }
 0x72b   : > { %p1917_p5 = pnand %p1916_p6, %p2614_p2  ;;  %p1924_p0 = por %p1923_p12, %p1922_p11 }
 0x72d   : > { %p1918_p7 = pneg %p1917_p5 }
 0x72f   : > { %p1925_p8 = pnand %p1924_p0, %p1918_p7 }
 0x79a   : > { %v1064_v44 = vpop.permute.xlu0 %1063 }
 0x79b   : > { %1067 = vst.msk [vmem:[#allocation5] sm:$0xf] %vm1066_vm7, %v1064_v44 }
 0x7a2   : > { %v1068_v9 = vld [vmem:[#allocation5] sm:$0xf] }
 0x7a3   : > { %1435 = vmatmul.mubr.msk.bf16.vlgmr.msra.gmra.mrb[12].mxu0 %vm518_vm0, %v1068_v9 }
 0x876   : > { %v1123_v45 = vpop.f32.mrb[12].mxu0 }
 0x877   : > { %1129 = vst.msk [vmem:[%s511_s10] sm:$0xff] %vm518_vm0, %v1123_v45  ;;  %v1436_v46 = vpop.f32.mrb[13].mxu0 }
 0x878   : > { %v1126_v47 = vpop.f32.mrb[14].mxu0 }
 0x879   : > { %1928 = shalt.err (!%p1925_p8)
}
 0x87a   : > { %s1929_s28 = scalar_lea.hbm %s2523_s23, 128  ;;  %s1933_s10 = scalar_lea.hbm %s2613_s3, 256 }
 0x87b   : > { %p1930_p9 = scmp.ne.s32.totalorder %s2523_s23, %s1929_s28  ;;  %p1934_p10 = scmp.lt.u32.totalorder %s2523_s23, %s2613_s3 }
 0x87c   : > { %p1935_p4 = scmp.lt.u32.totalorder %s1933_s10, %s1929_s28  ;;  %p1937_p6 = scmp.lt.u32.totalorder %s1929_s28, %s2523_s23 }
 0x87d   : > { %p1931_p1 = pnand %p1930_p9, %p2614_p2 }
 0x87e   : > { %p1936_p13 = por %p1935_p4, %p1934_p10 }
 0x87f   : > { %p1932_p3 = pneg %p1931_p1 }
 0x880   : > { %p1938_p5 = por %p1937_p6, %p1936_p13 }
 0x882   : > { %p1939_p7 = pnand %p1938_p5, %p1932_p3 }
 0x884   : > { %1942 = shalt.err (!%p1939_p7)
}
 0x885   : > { %1476 = dma.vmem_to_hbm [thread:$0]  (%p2614_p2), %s2525_s12, 128, %s2523_s23, %s1131_s20   ;;  %v1437_v48 = vpop.f32.mrb[15].mxu0 }
 0x886 PF: > { %s1157_s19 = sand.u32 1, %s1997_s13   ;;  %p2615_p11 = scmp.ne.s32.totalorder %s2607_s30, 0 }
 0x887   : > { %p2616_p12 = scmp.ge.s32.totalorder %s2017_s18, 2  ;;  %s1158_s21 = scalar_lea.sflag [#allocation8], %s1157_s19 }
 0x889   : > { %p1511_p0 = pnand %p2616_p12, %p2615_p11 }
 0x88b   : > { %1992 = dma.done.wait (!%p1511_p0), %s1158_s21, 128  }
 0x88c   : > { %1994 = vsyncadd (!%p1511_p0), %s1158_s21, 4294967168  ;;  %s31_s18 = sadd.s32 1, %s2017_s18   ;;  %s2617_s22 = smov %s2624_s16 }
 0x88d   : > { %p28_p8 = scmp.ge.s32.totalorder %s31_s18, 4   ;;  %s2618_s13 = smov %s2001_s14 }
 0x88e   : > { %s2619_s14 = smov %s2005_s15  ;;  %s2620_s15 = smov %s2364_s11 }
 0x88f   : > { %s2621_s16 = smov %s2013_s17  ;;  %s2622_s17 = smov %s2617_s22 }
 0x890   :  { %30 = sbr.rel (!%p28_p8) target bundleno = 15 (0xf), region = 152 }
 0x897   :  { %1163 = vsyncpa [#allocation7], 1 }
 0x898   :  { %1165 = vsyncpa [#allocation7 + $0x1], 1 }
 0x899   :  { %1166 = vsyncpa [#allocation10], 1 }
 0x89a   :  { %1167 = vsyncpa [#allocation13], 1 }
 0x89b   :  { %1168 = vsyncpa [#allocation16], 1 }
 0x89c   :  { %1169 = vsyncpa [#allocation19], 1 }
 0x89d   :  { %1170 = vsyncpa [#allocation22], 1 }
 0x89e   :  { %1171 = vsyncpa [#allocation8], 1 }
 0x89f   :  { %1173 = vsyncpa [#allocation8 + $0x1], 1 }

</bundles_post_ra>
